<compile_context>
chip_gen: v7x
topology: tpu7x:2x2x1
jax: 0.10.0
libtpu: 0.0.40
codegen_flags: <defaults>
</compile_context>

<pallas_src>
import functools
import math

import jax
import jax.numpy as jnp
from jax.experimental import pallas as pl
from jax.experimental.pallas import tpu as pltpu

LANE = 128
# Plan buffers against ~40 MiB, cap the compiler at 48 MiB: safe on v7x
# (64 MiB/TC) and above the 32 MiB scoped default on v5e/v6e.
_VMEM_PLAN_BYTES = 40 * 1024 * 1024
_VMEM_LIMIT_BYTES = 48 * 1024 * 1024


def _round_up(x, m):
    return (x + m - 1) // m * m


def _pick_tile(requested, total):
    """Largest multiple of 128 <= min(requested, total) that divides total."""
    t = max(LANE, (min(requested, total) // LANE) * LANE)
    while total % t != 0:
        t -= LANE
    return t


def _epilogue(agg_f32, w_ref, b_ref, *, n_valid_cols, apply_log_softmax):
    """act((agg @ W) + b); act = LeakyReLU(0.01) [+ masked log_softmax]."""
    # Projection on the native bf16 MXU path, accumulated in f32.
    z = jnp.dot(agg_f32.astype(w_ref.dtype), w_ref[...],
                preferred_element_type=jnp.float32) + b_ref[...]
    z = jnp.where(z > 0, z, 0.01 * z)          # LeakyReLU; dropout = identity
    if apply_log_softmax:
        # Mask lane-padding columns; keep all softmax math in f32.
        col = jax.lax.broadcasted_iota(jnp.int32, z.shape, 1)
        z = jnp.where(col < n_valid_cols, z, -1e30)
        m = jnp.max(z, axis=1, keepdims=True)
        lse = jnp.log(jnp.sum(jnp.exp(z - m), axis=1, keepdims=True)) + m
        z = z - lse
    return z


def _gcn_full_kernel(adj_ref, x_ref, w_ref, b_ref, out_ref, *,
                     n_valid_cols, apply_log_softmax):
    """Collapsed reduction: adj row band (tm, N) x resident x (N, F)."""
    agg = jnp.dot(adj_ref[...], x_ref[...], preferred_element_type=jnp.float32)
    z = _epilogue(agg, w_ref, b_ref, n_valid_cols=n_valid_cols,
                  apply_log_softmax=apply_log_softmax)
    out_ref[...] = z.astype(out_ref.dtype)


def _gcn_tiled_kernel(adj_ref, x_ref, w_ref, b_ref, out_ref, acc_ref, *,
                      tk, x_resident, n_valid_cols, apply_log_softmax):
    """Tiled reduction over k with f32 VMEM accumulator (large-graph path)."""
    k = pl.program_id(1)

    @pl.when(k == 0)
    def _():
        acc_ref[...] = jnp.zeros_like(acc_ref)

    if x_resident:
        start = pl.multiple_of(k * tk, tk)
        x_blk = x_ref[pl.ds(start, tk), :]
    else:
        x_blk = x_ref[...]
    acc_ref[...] += jnp.dot(adj_ref[...], x_blk,
                            preferred_element_type=jnp.float32)

    @pl.when(k == pl.num_programs(1) - 1)
    def _():
        z = _epilogue(acc_ref[...], w_ref, b_ref, n_valid_cols=n_valid_cols,
                      apply_log_softmax=apply_log_softmax)
        out_ref[...] = z.astype(out_ref.dtype)


def gcn_layer(adj_p, x_p, w_p, b_p, *, apply_log_softmax, n_valid_cols,
              out_dtype, tm=512, tk=512, force_mode=None,
              allow_resident_x=True):
    """One GCN layer on padded inputs.

    adj_p: (Np, Np) bf16   x_p: (Np, Fp) bf16
    w_p:   (Fp, Hp) bf16   b_p: (1, Hp) f32
    returns (Np, Hp) out_dtype
    """
    n_pad = adj_p.shape[0]
    f_pad = x_p.shape[1]
    h_pad = w_p.shape[1]

    tm = _pick_tile(tm, n_pad)
    # Prefer >=2 row tiles so the "parallel" axis can shard across both v7x
    # TensorCores (no-op on single-TC chips / tiny graphs).
    if n_pad // tm < 2 and n_pad >= 2 * LANE:
        tm = _pick_tile(n_pad // 2, n_pad)

    it_adj = jnp.dtype(adj_p.dtype).itemsize
    it_x = jnp.dtype(x_p.dtype).itemsize
    it_out = jnp.dtype(out_dtype).itemsize
    bytes_wb = 2 * (w_p.size * w_p.dtype.itemsize + b_p.size * b_p.dtype.itemsize)
    bytes_x_res = 2 * n_pad * f_pad * it_x           # conservative: 2 buffers
    bytes_out = 2 * tm * h_pad * it_out
    bytes_adj_band = 2 * tm * n_pad * it_adj

    full_fits = (bytes_adj_band + bytes_x_res + bytes_out + bytes_wb
                 <= _VMEM_PLAN_BYTES)
    mode = force_mode or ("full" if full_fits else "tiled")

    cparams = pltpu.CompilerParams(
        dimension_semantics=("parallel",) if mode == "full"
        else ("parallel", "arbitrary"),
        vmem_limit_bytes=_VMEM_LIMIT_BYTES,
    )

    if mode == "full":
        kernel = functools.partial(_gcn_full_kernel,
                                   n_valid_cols=n_valid_cols,
                                   apply_log_softmax=apply_log_softmax)
        return pl.pallas_call(
            kernel,
            out_shape=jax.ShapeDtypeStruct((n_pad, h_pad), out_dtype),
            grid_spec=pltpu.PrefetchScalarGridSpec(
                num_scalar_prefetch=0,
                grid=(n_pad // tm,),
                in_specs=[
                    pl.BlockSpec((tm, n_pad), lambda i: (i, 0)),      # adj band
                    pl.BlockSpec((n_pad, f_pad), lambda i: (0, 0)),   # x resident
                    pl.BlockSpec((f_pad, h_pad), lambda i: (0, 0)),   # W resident
                    pl.BlockSpec((1, h_pad), lambda i: (0, 0)),       # b resident
                ],
                out_specs=pl.BlockSpec((tm, h_pad), lambda i: (i, 0)),
            ),
            compiler_params=cparams,
        )(adj_p, x_p, w_p, b_p)

    # ---- tiled reduction path (large graphs) ----
    tk = _pick_tile(tk, n_pad)
    bytes_adj_tile = 2 * tm * tk * it_adj
    bytes_acc = tm * f_pad * 4
    x_resident = allow_resident_x and (
        bytes_adj_tile + bytes_x_res + bytes_out + bytes_wb + bytes_acc
        <= _VMEM_PLAN_BYTES)

    kernel = functools.partial(_gcn_tiled_kernel, tk=tk, x_resident=x_resident,
                               n_valid_cols=n_valid_cols,
                               apply_log_softmax=apply_log_softmax)
    x_spec = (pl.BlockSpec((n_pad, f_pad), lambda i, k: (0, 0)) if x_resident
              else pl.BlockSpec((tk, f_pad), lambda i, k: (k, 0)))
    return pl.pallas_call(
        kernel,
        out_shape=jax.ShapeDtypeStruct((n_pad, h_pad), out_dtype),
        grid_spec=pltpu.PrefetchScalarGridSpec(
            num_scalar_prefetch=0,
            grid=(n_pad // tm, n_pad // tk),
            in_specs=[
                pl.BlockSpec((tm, tk), lambda i, k: (i, k)),          # adj tile
                x_spec,                                               # x
                pl.BlockSpec((f_pad, h_pad), lambda i, k: (0, 0)),    # W resident
                pl.BlockSpec((1, h_pad), lambda i, k: (0, 0)),        # b resident
            ],
            out_specs=pl.BlockSpec((tm, h_pad), lambda i, k: (i, 0)),
            scratch_shapes=[pltpu.VMEM((tm, f_pad), jnp.float32)],
        ),
        compiler_params=cparams,
    )(adj_p, x_p, w_p, b_p)


def prepare_gnn_inputs(x, adj_norm, w1, b1, w2, b2):
    """Pad + cast ONCE per graph (hoisted out of the per-call forward)."""
    n, f = x.shape
    h = w1.shape[1]
    c = w2.shape[1]
    n_pad = _round_up(n, LANE)
    f_pad = _round_up(f, LANE)
    h_pad = _round_up(h, LANE)
    c_pad = _round_up(c, LANE)

    # Zero padding is mathematically inert (padded adj rows/cols are 0,
    # padded W rows/cols and bias entries are 0).
    adj_p = jnp.zeros((n_pad, n_pad), jnp.bfloat16)
    adj_p = adj_p.at[:n, :n].set(adj_norm.astype(jnp.bfloat16))
    x_p = jnp.zeros((n_pad, f_pad), jnp.bfloat16)
    x_p = x_p.at[:n, :f].set(x.astype(jnp.bfloat16))
    w1_p = jnp.zeros((f_pad, h_pad), jnp.bfloat16).at[:f, :h].set(
        w1.astype(jnp.bfloat16))
    b1_p = jnp.zeros((1, h_pad), jnp.float32).at[:, :h].set(
        jnp.asarray(b1, jnp.float32).reshape(1, -1))
    w2_p = jnp.zeros((h_pad, c_pad), jnp.bfloat16).at[:h, :c].set(
        w2.astype(jnp.bfloat16))
    b2_p = jnp.zeros((1, c_pad), jnp.float32).at[:, :c].set(
        jnp.asarray(b2, jnp.float32).reshape(1, -1))
    meta = dict(n=n, hidden=h, classes=c)
    return (adj_p, x_p, w1_p, b1_p, w2_p, b2_p), meta


def gnn_forward_padded(adj_p, x_p, w1_p, b1_p, w2_p, b2_p, *, hidden, classes,
                       tm=512, tk=512, force_mode=None, allow_resident_x=True):
    """Two GCN layers on pre-padded inputs. Returns padded (Np, Cp) log-probs."""
    # Layer 1: h = LeakyReLU(adj @ x @ W1 + b1); kept bf16 for layer 2.
    h1 = gcn_layer(adj_p, x_p, w1_p, b1_p,
                   apply_log_softmax=False, n_valid_cols=hidden,
                   out_dtype=jnp.bfloat16, tm=tm, tk=tk,
                   force_mode=force_mode, allow_resident_x=allow_resident_x)
    # Layer 2: log_softmax(LeakyReLU(adj @ h @ W2 + b2)) over C classes.
    # (reassociating as adj @ (h1 @ W2) is a no-op here since H and C both
    #  pad to 128 lanes.)
    z = gcn_layer(adj_p, h1, w2_p, b2_p,
                  apply_log_softmax=True, n_valid_cols=classes,
                  out_dtype=jnp.float32, tm=tm, tk=tk,
                  force_mode=force_mode, allow_resident_x=allow_resident_x)
    return z


def gnn_forward(x, adj_norm, w1, b1, w2, b2, *, tm=512, tk=512):
    """Convenience one-shot forward (pads internally). Returns (N, C)."""
    padded, meta = prepare_gnn_inputs(x, adj_norm, w1, b1, w2, b2)
    z = gnn_forward_padded(*padded, hidden=meta["hidden"],
                           classes=meta["classes"], tm=tm, tk=tk)
    return z[:meta["n"], :meta["classes"]]


def build_gcn_adj(edge_index, num_nodes):
    """Dense D^{-1/2}(A + I)D^{-1/2} for an unweighted simple graph."""
    src = edge_index[0]
    dst = edge_index[1]
    a = jnp.zeros((num_nodes, num_nodes), jnp.float32)
    a = a.at[dst, src].add(1.0)
    a = (a > 0).astype(jnp.float32)                 # dedup duplicate edges
    a = a + jnp.eye(num_nodes, dtype=jnp.float32)   # self loops
    deg = a.sum(axis=1)
    dinv = jnp.where(deg > 0, 1.0 / jnp.sqrt(deg), 0.0)
    return dinv[:, None] * a * dinv[None, :]


def gnn_reference(x, adj, w1, b1, w2, b2):
    """Pure-JAX f32 reference of the same forward pass."""
    h = adj @ (x @ w1) + b1
    h = jnp.where(h > 0, h, 0.01 * h)
    z = adj @ (h @ w2) + b2
    z = jnp.where(z > 0, z, 0.01 * z)
    return jax.nn.log_softmax(z, axis=1)


if __name__ == "__main__":
    key = jax.random.PRNGKey(0)
    k_x, k_e, k_w1, k_w2 = jax.random.split(key, 4)

    num_nodes = 200      # pads to 256 -> 2 row tiles (exercises megacore split)
    num_features = 8
    hidden = 64
    num_classes = 4
    num_edges = 600

    # Node features.
    x = jax.random.normal(k_x, (num_nodes, num_features), dtype=jnp.float32)

    # Random undirected edges.
    e = jax.random.randint(k_e, (2, num_edges), 0, num_nodes)
    edge_index = jnp.concatenate([e, e[::-1]], axis=1)  # (2, 2*E)

    # Glorot-style weights, zero biases (matches default GCNConv init style).
    def glorot(k, shape):
        lim = jnp.sqrt(6.0 / (shape[0] + shape[1]))
        return jax.random.uniform(k, shape, jnp.float32, -lim, lim)

    w1 = glorot(k_w1, (num_features, hidden))
    b1 = jnp.zeros((1, hidden), jnp.float32)
    w2 = glorot(k_w2, (hidden, num_classes))
    b2 = jnp.zeros((1, num_classes), jnp.float32)

    adj_norm = build_gcn_adj(edge_index, num_nodes)

    # Pad/cast once per graph, reused across layers and calls.
    padded, meta = prepare_gnn_inputs(x, adj_norm, w1, b1, w2, b2)

    fwd = jax.jit(functools.partial(gnn_forward_padded,
                                    hidden=meta["hidden"],
                                    classes=meta["classes"]))
    out_p = jax.block_until_ready(fwd(*padded))
    out = out_p[:num_nodes, :num_classes]

    ref = gnn_reference(x, adj_norm, w1, b1, w2, b2)

    # Checks: shape, rows exponentiate to valid probability distributions,
    # and agreement with the pure-f32 JAX reference (bf16 tolerance).
    assert out.shape == (num_nodes, num_classes)
    row_sums = jnp.exp(out).sum(axis=1)
    assert bool(jnp.all(jnp.abs(row_sums - 1.0) < 1e-3)), "row sums off"
    max_err = float(jnp.max(jnp.abs(out - ref)))
    assert max_err < 1e-1, f"full-path mismatch vs reference: {max_err}"

    # Also validate the tiled-reduction fallback paths (used for large graphs)
    # on-device at these small shapes, with resident and streamed x.
    for allow_resident in (True, False):
        out_t = gnn_forward_padded(*padded, hidden=hidden, classes=num_classes,
                                   tm=128, tk=128, force_mode="tiled",
                                   allow_resident_x=allow_resident)
        out_t = jax.block_until_ready(out_t)[:num_nodes, :num_classes]
        err_t = float(jnp.max(jnp.abs(out_t - ref)))
        assert err_t < 1e-1, (
            f"tiled-path mismatch (resident_x={allow_resident}): {err_t}")

    print("KERNEL_OK")
</pallas_src>

<mosaic_0001>
module attributes {stable_mosaic.version = 11 : i64} {
  func.func @_gcn_full_kernel(%arg0: i32, %arg1: memref<128x256xbf16, #tpu.memory_space<vmem>>, %arg2: memref<256x128xbf16, #tpu.memory_space<vmem>>, %arg3: memref<128x128xbf16, #tpu.memory_space<vmem>>, %arg4: memref<1x128xf32, #tpu.memory_space<vmem>>, %arg5: memref<128x128xbf16, #tpu.memory_space<vmem>>) attributes {dimension_semantics = [#tpu.dimension_semantics<parallel>], iteration_bounds = array<i64: 2>, scalar_prefetch = 0 : i64, scratch_operands = 0 : i64, tpu.core_type = #tpu.core_type<tc>, window_params = [{transform_indices = @transform_0, window_bounds = array<i64: 128, 256>}, {pipeline_mode = #tpu.pipeline_mode<synchronous>, transform_indices = @transform_1, window_bounds = array<i64: 256, 128>}, {pipeline_mode = #tpu.pipeline_mode<synchronous>, transform_indices = @transform_2, window_bounds = array<i64: 128, 128>}, {pipeline_mode = #tpu.pipeline_mode<synchronous>, transform_indices = @transform_3, window_bounds = array<i64: 1, 128>}, {transform_indices = @transform_4, window_bounds = array<i64: 128, 128>}]} {
    %c0 = arith.constant 0 : index
    %c0_0 = arith.constant 0 : index
    %0 = vector.load %arg1[%c0, %c0_0] : memref<128x256xbf16, #tpu.memory_space<vmem>>, vector<128x256xbf16>
    %c0_1 = arith.constant 0 : index
    %c0_2 = arith.constant 0 : index
    %1 = vector.load %arg2[%c0_1, %c0_2] : memref<256x128xbf16, #tpu.memory_space<vmem>>, vector<256x128xbf16>
    %cst = arith.constant dense<0.000000e+00> : vector<128x128xf32>
    %2 = tpu.matmul %0, %1, %cst {dimension_numbers = #tpu.dot_dimension_numbers<[1], [0], [0], [1], [0, 0, 1, 1], [], []>} : vector<128x256xbf16>, vector<256x128xbf16>, vector<128x128xf32> -> vector<128x128xf32>
    %3 = arith.truncf %2 : vector<128x128xf32> to vector<128x128xbf16>
    %c0_3 = arith.constant 0 : index
    %c0_4 = arith.constant 0 : index
    %4 = vector.load %arg3[%c0_3, %c0_4] : memref<128x128xbf16, #tpu.memory_space<vmem>>, vector<128x128xbf16>
    %cst_5 = arith.constant dense<0.000000e+00> : vector<128x128xf32>
    %5 = tpu.matmul %3, %4, %cst_5 {dimension_numbers = #tpu.dot_dimension_numbers<[1], [0], [0], [1], [0, 0, 1, 1], [], []>} : vector<128x128xbf16>, vector<128x128xbf16>, vector<128x128xf32> -> vector<128x128xf32>
    %c0_6 = arith.constant 0 : index
    %c0_7 = arith.constant 0 : index
    %6 = vector.load %arg4[%c0_6, %c0_7] : memref<1x128xf32, #tpu.memory_space<vmem>>, vector<1x128xf32>
    %7 = vector.broadcast %6 : vector<1x128xf32> to vector<128x128xf32>
    %8 = arith.addf %5, %7 : vector<128x128xf32>
    %cst_8 = arith.constant 0.000000e+00 : f32
    %9 = vector.broadcast %cst_8 : f32 to vector<128x128xf32>
    %10 = arith.cmpf ogt, %8, %9 : vector<128x128xf32>
    %cst_9 = arith.constant 0.00999999977 : f32
    %11 = vector.broadcast %cst_9 : f32 to vector<128x128xf32>
    %12 = arith.mulf %11, %8 : vector<128x128xf32>
    %13 = arith.select %10, %8, %12 : vector<128x128xi1>, vector<128x128xf32>
    %14 = arith.truncf %13 : vector<128x128xf32> to vector<128x128xbf16>
    %c0_10 = arith.constant 0 : index
    %c0_11 = arith.constant 0 : index
    %15 = vector.load %arg5[%c0_10, %c0_11] : memref<128x128xbf16, #tpu.memory_space<vmem>>, vector<128x128xbf16>
    tpu.vector_store %arg5[%c0_10, %c0_11], %14 {strides = array<i32>} : memref<128x128xbf16, #tpu.memory_space<vmem>>, vector<128x128xbf16>,
    return
  }
  func.func @transform_0(%arg0: i32) -> (i32, i32) {
    %c0_i32 = arith.constant 0 : i32
    %c0_i32_0 = arith.constant 0 : i32
    return %arg0, %c0_i32 : i32, i32
  }
  func.func @transform_1(%arg0: i32) -> (i32, i32) {
    %c0_i32 = arith.constant 0 : i32
    %c0_i32_0 = arith.constant 0 : i32
    %c0_i32_1 = arith.constant 0 : i32
    return %c0_i32, %c0_i32_0 : i32, i32
  }
  func.func @transform_2(%arg0: i32) -> (i32, i32) {
    %c0_i32 = arith.constant 0 : i32
    %c0_i32_0 = arith.constant 0 : i32
    %c0_i32_1 = arith.constant 0 : i32
    return %c0_i32, %c0_i32_0 : i32, i32
  }
  func.func @transform_3(%arg0: i32) -> (i32, i32) {
    %c0_i32 = arith.constant 0 : i32
    %c0_i32_0 = arith.constant 0 : i32
    %c0_i32_1 = arith.constant 0 : i32
    return %c0_i32, %c0_i32_0 : i32, i32
  }
  func.func @transform_4(%arg0: i32) -> (i32, i32) {
    %c0_i32 = arith.constant 0 : i32
    %c0_i32_0 = arith.constant 0 : i32
    return %arg0, %c0_i32 : i32, i32
  }
}

module attributes {stable_mosaic.version = 11 : i64} {
  func.func @_gcn_full_kernel(%arg0: i32, %arg1: memref<128x256xbf16, #tpu.memory_space<vmem>>, %arg2: memref<256x128xbf16, #tpu.memory_space<vmem>>, %arg3: memref<128x128xbf16, #tpu.memory_space<vmem>>, %arg4: memref<1x128xf32, #tpu.memory_space<vmem>>, %arg5: memref<128x128xf32, #tpu.memory_space<vmem>>) attributes {dimension_semantics = [#tpu.dimension_semantics<parallel>], iteration_bounds = array<i64: 2>, scalar_prefetch = 0 : i64, scratch_operands = 0 : i64, tpu.core_type = #tpu.core_type<tc>, window_params = [{transform_indices = @transform_0, window_bounds = array<i64: 128, 256>}, {pipeline_mode = #tpu.pipeline_mode<synchronous>, transform_indices = @transform_1, window_bounds = array<i64: 256, 128>}, {pipeline_mode = #tpu.pipeline_mode<synchronous>, transform_indices = @transform_2, window_bounds = array<i64: 128, 128>}, {pipeline_mode = #tpu.pipeline_mode<synchronous>, transform_indices = @transform_3, window_bounds = array<i64: 1, 128>}, {transform_indices = @transform_4, window_bounds = array<i64: 128, 128>}]} {
    %c0 = arith.constant 0 : index
    %c0_0 = arith.constant 0 : index
    %0 = vector.load %arg1[%c0, %c0_0] : memref<128x256xbf16, #tpu.memory_space<vmem>>, vector<128x256xbf16>
    %c0_1 = arith.constant 0 : index
    %c0_2 = arith.constant 0 : index
    %1 = vector.load %arg2[%c0_1, %c0_2] : memref<256x128xbf16, #tpu.memory_space<vmem>>, vector<256x128xbf16>
    %cst = arith.constant dense<0.000000e+00> : vector<128x128xf32>
    %2 = tpu.matmul %0, %1, %cst {dimension_numbers = #tpu.dot_dimension_numbers<[1], [0], [0], [1], [0, 0, 1, 1], [], []>} : vector<128x256xbf16>, vector<256x128xbf16>, vector<128x128xf32> -> vector<128x128xf32>
    %3 = arith.truncf %2 : vector<128x128xf32> to vector<128x128xbf16>
    %c0_3 = arith.constant 0 : index
    %c0_4 = arith.constant 0 : index
    %4 = vector.load %arg3[%c0_3, %c0_4] : memref<128x128xbf16, #tpu.memory_space<vmem>>, vector<128x128xbf16>
    %cst_5 = arith.constant dense<0.000000e+00> : vector<128x128xf32>
    %5 = tpu.matmul %3, %4, %cst_5 {dimension_numbers = #tpu.dot_dimension_numbers<[1], [0], [0], [1], [0, 0, 1, 1], [], []>} : vector<128x128xbf16>, vector<128x128xbf16>, vector<128x128xf32> -> vector<128x128xf32>
    %c0_6 = arith.constant 0 : index
    %c0_7 = arith.constant 0 : index
    %6 = vector.load %arg4[%c0_6, %c0_7] : memref<1x128xf32, #tpu.memory_space<vmem>>, vector<1x128xf32>
    %7 = vector.broadcast %6 : vector<1x128xf32> to vector<128x128xf32>
    %8 = arith.addf %5, %7 : vector<128x128xf32>
    %cst_8 = arith.constant 0.000000e+00 : f32
    %9 = vector.broadcast %cst_8 : f32 to vector<128x128xf32>
    %10 = arith.cmpf ogt, %8, %9 : vector<128x128xf32>
    %cst_9 = arith.constant 0.00999999977 : f32
    %11 = vector.broadcast %cst_9 : f32 to vector<128x128xf32>
    %12 = arith.mulf %11, %8 : vector<128x128xf32>
    %13 = arith.select %10, %8, %12 : vector<128x128xi1>, vector<128x128xf32>
    %14 = tpu.iota {dimensions = array<i32: 1>} : vector<128x128xi32>
    %c4_i32 = arith.constant 4 : i32
    %15 = vector.broadcast %c4_i32 : i32 to vector<128x128xi32>
    %16 = arith.cmpi slt, %14, %15 : vector<128x128xi32>
    %cst_10 = arith.constant -1.000000e+30 : f32
    %17 = vector.broadcast %cst_10 : f32 to vector<128x128xf32>
    %18 = arith.select %16, %13, %17 : vector<128x128xi1>, vector<128x128xf32>
    %cst_11 = arith.constant dense<0xFF800000> : vector<128xf32>
    %19 = vector.multi_reduction <maximumf>, %18, %cst_11 [1] : vector<128x128xf32> to vector<128xf32>
    %20 = vector.shape_cast %19 : vector<128xf32> to vector<128x1xf32>
    %21 = vector.broadcast %20 : vector<128x1xf32> to vector<128x128xf32>
    %22 = arith.subf %18, %21 : vector<128x128xf32>
    %23 = math.exp %22 : vector<128x128xf32>
    %cst_12 = arith.constant dense<0.000000e+00> : vector<128xf32>
    %24 = vector.multi_reduction <add>, %23, %cst_12 [1] : vector<128x128xf32> to vector<128xf32>
    %25 = vector.shape_cast %24 : vector<128xf32> to vector<128x1xf32>
    %26 = math.log %25 : vector<128x1xf32>
    %27 = arith.addf %26, %20 : vector<128x1xf32>
    %28 = vector.broadcast %27 : vector<128x1xf32> to vector<128x128xf32>
    %29 = arith.subf %18, %28 : vector<128x128xf32>
    %c0_13 = arith.constant 0 : index
    %c0_14 = arith.constant 0 : index
    %30 = vector.load %arg5[%c0_13, %c0_14] : memref<128x128xf32, #tpu.memory_space<vmem>>, vector<128x128xf32>
    tpu.vector_store %arg5[%c0_13, %c0_14], %29 {strides = array<i32>} : memref<128x128xf32, #tpu.memory_space<vmem>>, vector<128x128xf32>,
    return
  }
  func.func @transform_0(%arg0: i32) -> (i32, i32) {
    %c0_i32 = arith.constant 0 : i32
    %c0_i32_0 = arith.constant 0 : i32
    return %arg0, %c0_i32 : i32, i32
  }
  func.func @transform_1(%arg0: i32) -> (i32, i32) {
    %c0_i32 = arith.constant 0 : i32
    %c0_i32_0 = arith.constant 0 : i32
    %c0_i32_1 = arith.constant 0 : i32
    return %c0_i32, %c0_i32_0 : i32, i32
  }
  func.func @transform_2(%arg0: i32) -> (i32, i32) {
    %c0_i32 = arith.constant 0 : i32
    %c0_i32_0 = arith.constant 0 : i32
    %c0_i32_1 = arith.constant 0 : i32
    return %c0_i32, %c0_i32_0 : i32, i32
  }
  func.func @transform_3(%arg0: i32) -> (i32, i32) {
    %c0_i32 = arith.constant 0 : i32
    %c0_i32_0 = arith.constant 0 : i32
    %c0_i32_1 = arith.constant 0 : i32
    return %c0_i32, %c0_i32_0 : i32, i32
  }
  func.func @transform_4(%arg0: i32) -> (i32, i32) {
    %c0_i32 = arith.constant 0 : i32
    %c0_i32_0 = arith.constant 0 : i32
    return %arg0, %c0_i32 : i32, i32
  }
}

</mosaic_0001>

<bundles_post_ra>
// kernel: gnn_forward_padded.3
= control target key start
LH: loop header
LB: loop body
LE: loop exit
PB: predicated region body
PF: predicated region fallthrough
CT: control target
= control target key end

     0   :  { %9 = vsyncpa [#allocation3], 0  ;;  %s1863_s0 = inlined_call_operand.vmem [shape: bf16[256,256], index: 0, kind: input, shape index: {}]   ;;  %s1864_s1 = inlined_call_operand.vmem [shape: bf16[256,128], index: 1, kind: input, shape index: {}]   ;;  %s1865_s2 = inlined_call_operand.vmem [shape: bf16[128,128], index: 2, kind: input, shape index: {}]   ;;  %s1866_s3 = inlined_call_operand.vmem [shape: f32[1,128], index: 3, kind: input, shape index: {}]   ;;  %s1867_s4 = inlined_call_operand.hbm [shape: f32[256,128], index: 4, kind: output, shape index: {}]  }
   0x1   :  { %11 = vsyncpa [#allocation3 + $0x1], 0  ;;  %s1448_s15 = smov 0   ;;  %s1450_s16 = smov 0  }
   0x2   :  { %s1452_s17 = smov 0   ;;  %s1454_s18 = smov 0  }
   0x3 LB: > { %s1469_s19 = sadd.s32 4294967295, %s1418_s18   ;;  %s1035_s20 = sadd.s32 4294967294, %s1418_s18   ;;  %s1418_s18 = sphi %s1454_s18, %s1873_s18   ;;  %s1414_s17 = sphi %s1452_s17, %s1872_s17   ;;  %s1410_s16 = sphi %s1450_s16, %s1871_s16   ;;  %s1406_s15 = sphi %s1448_s15, %s1870_s15  }
   0x4   : > { %s1473_s21 = sadd.s32 1, %s1418_s18   ;;  %s113_s22 = sadd.s32 1, %s1414_s17 }
   0x5   : > { %s110_s23 = ssub.s32 %s1418_s18, %s1473_s21  ;;  %p123_p0 = scmp.ne.s32.totalorder %s1414_s17, %s1410_s16 }
   0x6   : > { %p111_p1 = scmp.eq.s32.totalorder %s110_s23, 0  ;;  %p124_p2 = scmp.eq.s32.totalorder %s1469_s19, 1 }
   0x7   : > { %p129_p3 = scmp.ne.s32.totalorder %s1410_s16, %s1406_s15  ;;  %p130_p4 = scmp.eq.s32.totalorder %s1035_s20, 1 }
   0x8   : > { %s1484_s24 = scalar_select %p111_p1, %s1414_s17, %s113_s22  }
   0x9   : > { %p1486_p5 = por %p124_p2, %p123_p0  ;;  %p1490_p6 = por %p130_p4, %p129_p3 }
   0xa   : > { %p1038_p7 = scmp.ge.s32.totalorder %s1418_s18, 1  ;;  %p167_p8 = scmp.lt.s32.totalorder %s1418_s18, 3 }
   0xc   : > { %p168_p9 = pnand %p1038_p7, %p167_p8 }
   0xd   : > { %v1244_v0 = vld [vmem:[%s1864_s1 + $0x40] sm:$0xff] (!%p168_p9)   ;;  %s1040_s29 = sshll.u32 (!%p168_p9), %s1469_s19, 4  ;;  %v1246_v2 = vld [vmem:[%s1864_s1 + $0x48] sm:$0xff] (!%p168_p9)   ;;  %v1248_v4 = vld [vmem:[%s1864_s1 + $0x50] sm:$0xff] (!%p168_p9)   ;;  %s191_s6 = sand.u32 (!%p168_p9), 1, %s1410_s16  }
   0xe   : > { %171 = sbr.rel (%p168_p9) target bundleno = 877 (0x36d), region = 36  ;;  %v1245_v1 = vld [vmem:[%s1864_s1] sm:$0xff] (!%p168_p9)   ;;  %1091 = vmatprep.subr.bf16.mxu0 (!%p168_p9), %v1244_v0  ;;  %v1247_v3 = vld [vmem:[%s1864_s1 + $0x8] sm:$0xff] (!%p168_p9)   ;;  %p195_p10 = scmp.lt.s32.totalorder (!%p168_p9), %s1040_s29, 31  ;;  %v1249_v5 = vld [vmem:[%s1864_s1 + $0x10] sm:$0xff] (!%p168_p9)  }
   0xf   : > { %1092 = vmatpush3.bf16.msra.mxu0 (!%p168_p9), %v1245_v1  ;;  %v1250_v6 = vld [vmem:[%s1864_s1 + $0x58] sm:$0xff] (!%p168_p9)   ;;  %v1252_v8 = vld [vmem:[%s1864_s1 + $0x60] sm:$0xff] (!%p168_p9)   ;;  %v1254_v10 = vld [vmem:[%s1864_s1 + $0x68] sm:$0xff] (!%p168_p9)   ;;  %s1039_s8 = sshll.u32 (!%p168_p9), %s191_s6, 7  ;;  %s1090_s10 = sshll.u32 (!%p168_p9), %s1469_s19, 11 }
  0x10   : > { %1093 = vmatprep.subr.bf16.mxu0 (!%p168_p9), %v1246_v2  ;;  %v1251_v7 = vld [vmem:[%s1864_s1 + $0x18] sm:$0xff] (!%p168_p9)   ;;  %v1253_v9 = vld [vmem:[%s1864_s1 + $0x20] sm:$0xff] (!%p168_p9)   ;;  %v1255_v12 = vld [vmem:[%s1864_s1 + $0x28] sm:$0xff] (!%p168_p9)   ;;  %s1763_s9 = scalar_lea.vmem (!%p168_p9), [#allocation2], %s1039_s8  ;;  %s1813_s13 = scalar_lea.hbm (!%p168_p9), %s1867_s4, %s1090_s10 }
  0x11   : > { %v1256_v13 = vld [vmem:[%s1864_s1 + $0x70] sm:$0xff] (!%p168_p9)   ;;  %v1258_v15 = vld [vmem:[%s1864_s1 + $0x78] sm:$0xff] (!%p168_p9)   ;;  %v1284_v17 = vld [vmem:[%s1865_s2] sm:$0xff] (!%p168_p9)   ;;  %s973_s11 = sshll.u32 (!%p168_p9), %s1763_s9, 4  ;;  %s1822_s19 = scalar_lea.sflag (!%p168_p9), [#allocation3], %s191_s6  ;;  %s1815_s11 = int_to_ptr.vmem [resolvable:$true] %s973_s11 }
  0x12   : > { %v1257_v14 = vld [vmem:[%s1864_s1 + $0x30] sm:$0xff] (!%p168_p9)   ;;  %v1259_v16 = vld [vmem:[%s1864_s1 + $0x38] sm:$0xff] (!%p168_p9)   ;;  %v1285_v19 = vld [vmem:[%s1865_s2 + $0x8] sm:$0xff] (!%p168_p9)   ;;  %1171 = vmatprep.subr.bf16.mxu1 (!%p168_p9), %v1284_v17  ;;  %s1356_s14 = scalar_lea.vmem (!%p168_p9), %s1815_s11, 2048  ;;  %s1420_s20 = smov (!%p168_p9), [#allocation2]  }
  0x13   : > { %1094 = vmatpush3.bf16.msra.mxu0 (!%p168_p9), %v1247_v3  ;;  %1172 = vmatpush3.bf16.msra.mxu1 (!%p168_p9), %v1284_v17  ;;  %v1286_v21 = vld [vmem:[%s1865_s2 + $0x10] sm:$0xff] (!%p168_p9)   ;;  %v1287_v22 = vld [vmem:[%s1865_s2 + $0x18] sm:$0xff] (!%p168_p9)   ;;  %v1288_v36 = vld [vmem:[%s1865_s2 + $0x20] sm:$0xff] (!%p168_p9)   ;;  %p1357_p11 = scmp.ne.s32.totalorder (!%p168_p9), %s1815_s11, %s1356_s14  ;;  %s1360_s22 = sshll.u32 (!%p168_p9), %s1420_s20, 4  ;;  %s1361_s22 = int_to_ptr.vmem [resolvable:$false] %s1360_s22 }
  0x14   : > { %1095 = vmatprep.subr.bf16.mxu0 (!%p168_p9), %v1248_v4  ;;  %1173 = vmatprep.subr.bf16.mxu1 (!%p168_p9), %v1285_v19  ;;  %v1289_v37 = vld [vmem:[%s1865_s2 + $0x28] sm:$0xff] (!%p168_p9)   ;;  %v1290_v38 = vld [vmem:[%s1865_s2 + $0x30] sm:$0xff] (!%p168_p9)   ;;  %v1291_v39 = vld [vmem:[%s1865_s2 + $0x38] sm:$0xff] (!%p168_p9)   ;;  %s1362_s23 = scalar_lea.vmem (!%p168_p9), %s1361_s22, 4096  ;;  %p1363_p0 = scmp.lt.s32.totalorder (!%p168_p9), %s1815_s11, %s1361_s22 }
  0x15   : > { %s1875_s29 = smov (!%p195_p10, %s1040_s29), 31  ;;  %p1358_p12 = pnand %p1357_p11, %p1486_p5 }
  0x16   : > { %s1089_s27 = sshll.u32 %s1875_s29, 3  ;;  %p1364_p1 = scmp.lt.s32.totalorder %s1362_s23, %s1356_s14 }
  0x17   : > { %1096 = vmatpush3.bf16.msra.mxu0 %v1249_v5  ;;  %s1527_s7 = scalar_lea.vmem %s1863_s0, %s1089_s27  ;;  %1174 = vmatpush3.bf16.msra.mxu1 %v1285_v19  ;;  %p1359_p13 = pneg %p1358_p12 }
  0x18   : > { %1097 = vmatprep.subr.bf16.mxu0 %v1250_v6  ;;  %v1262_v11 = vld [vmem:[%s1527_s7 + $0x4] ss:$8 sps:$4 sm:$0xff]   ;;  %v1260_v18 = vld [vmem:[%s1527_s7] ss:$8 sps:$4 sm:$0xff]   ;;  %v1263_v20 = vld [vmem:[%s1527_s7 + $0x14] ss:$8 sps:$4 sm:$0xff]   ;;  %1175 = vmatprep.subr.bf16.mxu1 %v1286_v21  ;;  %p1365_p2 = por %p1364_p1, %p1363_p0 }
  0x19   : > { %459 = vmatprep.mubr.bf16.mxu0 %v1262_v11  ;;  %v1265_v23 = vld [vmem:[%s1527_s7 + $0x10] ss:$8 sps:$4 sm:$0xff]   ;;  %v1266_v24 = vld [vmem:[%s1527_s7 + $0x24] ss:$8 sps:$4 sm:$0xff]   ;;  %v1268_v25 = vld [vmem:[%s1527_s7 + $0x20] ss:$8 sps:$4 sm:$0xff]  }
  0x1a   : > { %v1269_v26 = vld [vmem:[%s1527_s7 + $0x34] ss:$8 sps:$4 sm:$0xff]   ;;  %v1271_v27 = vld [vmem:[%s1527_s7 + $0x30] ss:$8 sps:$4 sm:$0xff]   ;;  %v1272_v28 = vld [vmem:[%s1527_s7 + $0x44] ss:$8 sps:$4 sm:$0xff]   ;;  %p1366_p3 = pnand %p1365_p2, %p1359_p13 }
  0x1b   : > { %1098 = vmatpush3.bf16.msra.mxu0 %v1251_v7  ;;  %1176 = vmatpush3.bf16.msra.mxu1 %v1286_v21  ;;  %v1274_v29 = vld [vmem:[%s1527_s7 + $0x40] ss:$8 sps:$4 sm:$0xff]   ;;  %v1275_v30 = vld [vmem:[%s1527_s7 + $0x54] ss:$8 sps:$4 sm:$0xff]   ;;  %v1277_v31 = vld [vmem:[%s1527_s7 + $0x50] ss:$8 sps:$4 sm:$0xff]  }
  0x1c   : > { %1099 = vmatprep.subr.bf16.mxu0 %v1252_v8  ;;  %1177 = vmatprep.subr.bf16.mxu1 %v1287_v22  ;;  %v1278_v32 = vld [vmem:[%s1527_s7 + $0x64] ss:$8 sps:$4 sm:$0xff]   ;;  %v1280_v33 = vld [vmem:[%s1527_s7 + $0x60] ss:$8 sps:$4 sm:$0xff]   ;;  %v1281_v34 = vld [vmem:[%s1527_s7 + $0x74] ss:$8 sps:$4 sm:$0xff]  }
  0x1d   : > { %v1283_v35 = vld [vmem:[%s1527_s7 + $0x70] ss:$8 sps:$4 sm:$0xff]  }
  0x1f   : > { %1100 = vmatpush3.bf16.msra.mxu0 %v1253_v9  ;;  %1178 = vmatpush3.bf16.msra.mxu1 %v1287_v22 }
  0x20   : > { %1101 = vmatprep.subr.bf16.mxu0 %v1254_v10  ;;  %1179 = vmatprep.subr.bf16.mxu1 %v1288_v36 }
  0x23   : > { %1102 = vmatpush3.bf16.msra.mxu0 %v1255_v12  ;;  %1180 = vmatpush3.bf16.msra.mxu1 %v1288_v36 }
  0x24   : > { %1103 = vmatprep.subr.bf16.mxu0 %v1256_v13  ;;  %1181 = vmatprep.subr.bf16.mxu1 %v1289_v37 }
  0x27   : > { %1104 = vmatpush3.bf16.msra.mxu0 %v1257_v14  ;;  %1182 = vmatpush3.bf16.msra.mxu1 %v1289_v37 }
  0x28   : > { %1105 = vmatprep.subr.bf16.mxu0 %v1258_v15  ;;  %1183 = vmatprep.subr.bf16.mxu1 %v1290_v38 }
  0x2b   : > { %1106 = vmatpush3.bf16.msra.mxu0 %v1259_v16  ;;  %1184 = vmatpush3.bf16.msra.mxu1 %v1290_v38 }
  0x2c   : > { %1185 = vmatprep.subr.bf16.mxu1 %v1291_v39 }
  0x2e   : > { %460 = vmatmul.mubr.bf16.vlgmr.msra.gmra.mrb[0].mxu0 %v1260_v18 }
  0x2f   : > { %467 = vmatprep.mubr.bf16.mxu0 %v1263_v20  ;;  %1186 = vmatpush3.bf16.msra.mxu1 %v1291_v39 }
  0x36   : > { %468 = vmatmul.mubr.bf16.gmra.mrb[4].mxu0 %v1265_v23 }
  0x37   : > { %475 = vmatprep.mubr.bf16.mxu0 %v1266_v24 }
  0x3e   : > { %476 = vmatmul.mubr.bf16.gmra.mrb[8].mxu0 %v1268_v25 }
  0x3f   : > { %483 = vmatprep.mubr.bf16.mxu0 %v1269_v26 }
  0x46   : > { %484 = vmatmul.mubr.bf16.gmra.mrb[12].mxu0 %v1271_v27 }
  0x47   : > { %491 = vmatprep.mubr.bf16.mxu0 %v1272_v28 }
  0x4e   : > { %492 = vmatmul.mubr.bf16.gmra.mrb[16].mxu0 %v1274_v29 }
  0x4f   : > { %499 = vmatprep.mubr.bf16.mxu0 %v1275_v30 }
  0x56   : > { %500 = vmatmul.mubr.bf16.gmra.mrb[20].mxu0 %v1277_v31 }
  0x57   : > { %507 = vmatprep.mubr.bf16.mxu0 %v1278_v32  ;;  %v748_v32 = vlaneseq }
  0x5e   : > { %508 = vmatmul.mubr.bf16.gmra.mrb[24].mxu0 %v1280_v33  ;;  %v1593_v33 = vld [vmem:[%s1866_s3] ss:$0 sm:$0xff] }
  0x5f   : > { %515 = vmatprep.mubr.bf16.mxu0 %v1281_v34  ;;  %v1595_v34 = vand.u32 127, %v748_v32 }
  0x61   : > { %vm750_vm1 = vcmp.lt.s32.totalorder %v1595_v34, 4 }
  0x66   : > { %516 = vmatmul.mubr.bf16.gmra.mrb[28].mxu0 %v1283_v35 }
 0x101   : > { %v1107_v40 = vpop.f32.mrb[0].mxu0 }
 0x102   : > { %v1108_v41 = vpop.f32.mrb[1].mxu0 }
 0x103   : > { %v1109_v42 = vadd.f32 %v1108_v41, %v1107_v40  ;;  %v1110_v43 = vpop.f32.mrb[2].mxu0 }
 0x104   : > { %v1111_v44 = vpop.f32.mrb[3].mxu0 }
 0x105   : > { %v1112_v45 = vadd.f32 %v1111_v44, %v1110_v43 }
 0x107   : > { %v524_v46 = vpack.c.bf16 %v1112_v45, %v1109_v42 }
 0x109   : > { %v1113_v47 = vpop.f32.mrb[4].mxu0  ;;  %1187 = vmatprep.mubr.bf16.mxu1 %v524_v46 }
 0x10a   : > { %v1114_v48 = vpop.f32.mrb[5].mxu0 }
 0x10b   : > { %v1115_v49 = vadd.f32 %v1114_v48, %v1113_v47  ;;  %v1116_v50 = vpop.f32.mrb[6].mxu0 }
 0x10c   : > { %v1117_v51 = vpop.f32.mrb[7].mxu0 }
 0x10d   : > { %v1118_v52 = vadd.f32 %v1117_v51, %v1116_v50 }
 0x10f   : > { %v525_v53 = vpack.c.bf16 %v1118_v52, %v1115_v49 }
 0x111   : > { %v1119_v54 = vpop.f32.mrb[8].mxu0  ;;  %1188 = vmatmul.mubr.bf16.vlgmr.msra.gmra.mrb[0].mxu1 %v525_v53 }
 0x112   : > { %v1120_v55 = vpop.f32.mrb[9].mxu0 }
 0x113   : > { %v1121_v56 = vadd.f32 %v1120_v55, %v1119_v54  ;;  %v1122_v57 = vpop.f32.mrb[10].mxu0 }
 0x114   : > { %v1123_v58 = vpop.f32.mrb[11].mxu0 }
 0x115   : > { %v1124_v59 = vadd.f32 %v1123_v58, %v1122_v57 }
 0x117   : > { %v526_v60 = vpack.c.bf16 %v1124_v59, %v1121_v56 }
 0x119   : > { %v1125_v61 = vpop.f32.mrb[12].mxu0  ;;  %1191 = vmatprep.mubr.bf16.mxu1 %v526_v60 }
 0x11a   : > { %v1126_v62 = vpop.f32.mrb[13].mxu0 }
 0x11b   : > { %v1127_v63 = vadd.f32 %v1126_v62, %v1125_v61  ;;  %v1128_v0 = vpop.f32.mrb[14].mxu0 }
 0x11c   : > { %v1129_v1 = vpop.f32.mrb[15].mxu0 }
 0x11d   : > { %v1130_v2 = vadd.f32 %v1129_v1, %v1128_v0 }
 0x11f   : > { %v527_v3 = vpack.c.bf16 %v1130_v2, %v1127_v63 }
 0x121   : > { %v1131_v4 = vpop.f32.mrb[16].mxu0  ;;  %1192 = vmatmul.mubr.bf16.gmra.mrb[4].mxu1 %v527_v3 }
 0x122   : > { %v1132_v5 = vpop.f32.mrb[17].mxu0 }
 0x123   : > { %v1133_v6 = vadd.f32 %v1132_v5, %v1131_v4  ;;  %v1134_v7 = vpop.f32.mrb[18].mxu0 }
 0x124   : > { %v1135_v8 = vpop.f32.mrb[19].mxu0 }
 0x125   : > { %v1136_v9 = vadd.f32 %v1135_v8, %v1134_v7 }
 0x127   : > { %v528_v10 = vpack.c.bf16 %v1136_v9, %v1133_v6 }
 0x129   : > { %v1137_v11 = vpop.f32.mrb[20].mxu0  ;;  %1195 = vmatprep.mubr.bf16.mxu1 %v528_v10 }
 0x12a   : > { %v1138_v12 = vpop.f32.mrb[21].mxu0 }
 0x12b   : > { %v1139_v13 = vadd.f32 %v1138_v12, %v1137_v11  ;;  %v1140_v14 = vpop.f32.mrb[22].mxu0 }
 0x12c   : > { %v1141_v15 = vpop.f32.mrb[23].mxu0 }
 0x12d   : > { %v1142_v16 = vadd.f32 %v1141_v15, %v1140_v14 }
 0x12f   : > { %v529_v17 = vpack.c.bf16 %v1142_v16, %v1139_v13 }
 0x131   : > { %v1143_v18 = vpop.f32.mrb[24].mxu0  ;;  %1196 = vmatmul.mubr.bf16.gmra.mrb[8].mxu1 %v529_v17 }
 0x132   : > { %v1144_v19 = vpop.f32.mrb[25].mxu0 }
 0x133   : > { %v1145_v20 = vadd.f32 %v1144_v19, %v1143_v18  ;;  %v1146_v21 = vpop.f32.mrb[26].mxu0 }
 0x134   : > { %v1147_v22 = vpop.f32.mrb[27].mxu0 }
 0x135   : > { %v1148_v23 = vadd.f32 %v1147_v22, %v1146_v21 }
 0x137   : > { %v530_v24 = vpack.c.bf16 %v1148_v23, %v1145_v20 }
 0x139   : > { %v1149_v25 = vpop.f32.mrb[28].mxu0  ;;  %1199 = vmatprep.mubr.bf16.mxu1 %v530_v24 }
 0x13a   : > { %v1150_v26 = vpop.f32.mrb[29].mxu0 }
 0x13b   : > { %v1151_v27 = vadd.f32 %v1150_v26, %v1149_v25  ;;  %v1152_v28 = vpop.f32.mrb[30].mxu0 }
 0x13c   : > { %v1153_v29 = vpop.f32.mrb[31].mxu0 }
 0x13d   : > { %v1154_v30 = vadd.f32 %v1153_v29, %v1152_v28 }
 0x13f   : > { %v531_v31 = vpack.c.bf16 %v1154_v30, %v1151_v27 }
 0x141   : > { %1200 = vmatmul.mubr.bf16.gmra.mrb[12].mxu1 %v531_v31 }
 0x1e4   : > { %v1189_v35 = vpop.f32.mrb[0].mxu1 }
 0x1e5   : > { %v646_v36 = vadd.f32 %v1189_v35, %v1593_v33  ;;  %v637_v37 = vpop.f32.mrb[1].mxu1 }
 0x1e6   : > { %v638_v38 = vadd.f32 %v1593_v33, %v637_v37  ;;  %v1190_v39 = vpop.f32.mrb[2].mxu1 }
 0x1e7   : > { %v718_v40 = vmul.f32 0.01, %v646_v36  ;;  %v649_v41 = vadd.f32 %v1190_v39, %v1593_v33  ;;  %v640_v42 = vpop.f32.mrb[3].mxu1  ;;  %vm702_vm0 = vcmp.gt.f32.partialorder %v646_v36, 0.0 }
 0x1e8   : > { %v716_v43 = vmul.f32 0.01, %v638_v38  ;;  %v641_v44 = vadd.f32 %v1593_v33, %v640_v42  ;;  %vm700_vm2 = vcmp.gt.f32.partialorder %v638_v38, 0.0 }
 0x1e9   : > { %v719_v45 = vmul.f32 0.01, %v649_v41  ;;  %v734_v46 = vsel %vm702_vm0, %v646_v36, %v718_v40  ;;  %vm703_vm3 = vcmp.gt.f32.partialorder %v649_v41, 0.0 }
 0x1ea   : > { %v717_v47 = vmul.f32 0.01, %v641_v44  ;;  %v1604_v48 = vsel %vm750_vm1, %v734_v46, -1e+30  ;;  %v732_v49 = vsel %vm700_vm2, %v638_v38, %v716_v43  ;;  %vm701_vm4 = vcmp.gt.f32.partialorder %v641_v44, 0.0 }
 0x1eb   : > { %771 = vmax.xlane.f32.xlu1 %v1604_v48  ;;  %v1609_v50 = vsel %vm750_vm1, %v732_v49, -1e+30  ;;  %v735_v51 = vsel %vm703_vm3, %v649_v41, %v719_v45 }
 0x1ec   : > { %767 = vmax.xlane.f32.xlu0 %v1609_v50  ;;  %v733_v52 = vsel %vm701_vm4, %v641_v44, %v717_v47  ;;  %v1614_v53 = vsel %vm750_vm1, %v735_v51, -1e+30 }
 0x1ed   : > { %v1619_v54 = vsel %vm750_vm1, %v733_v52, -1e+30 }
 0x1ef   : > { %773 = vmax.xlane.f32.xlu1 %v1614_v53 }
 0x1f0   : > { %769 = vmax.xlane.f32.xlu0 %v1619_v54 }
 0x1f4   : > { %v1193_v55 = vpop.f32.mrb[4].mxu1 }
 0x1f5   : > { %v662_v56 = vadd.f32 %v1193_v55, %v1593_v33  ;;  %v653_v57 = vpop.f32.mrb[5].mxu1 }
 0x1f6   : > { %v654_v58 = vadd.f32 %v1593_v33, %v653_v57  ;;  %v1194_v59 = vpop.f32.mrb[6].mxu1 }
 0x1f7   : > { %v722_v60 = vmul.f32 0.01, %v662_v56  ;;  %v665_v61 = vadd.f32 %v1194_v59, %v1593_v33  ;;  %v656_v62 = vpop.f32.mrb[7].mxu1  ;;  %vm706_vm5 = vcmp.gt.f32.partialorder %v662_v56, 0.0 }
 0x1f8   : > { %v720_v63 = vmul.f32 0.01, %v654_v58  ;;  %v657_v0 = vadd.f32 %v1593_v33, %v656_v62  ;;  %vm704_vm6 = vcmp.gt.f32.partialorder %v654_v58, 0.0 }
 0x1f9   : > { %v723_v1 = vmul.f32 0.01, %v665_v61  ;;  %v738_v2 = vsel %vm706_vm5, %v662_v56, %v722_v60  ;;  %vm707_vm7 = vcmp.gt.f32.partialorder %v665_v61, 0.0 }
 0x1fa   : > { %v721_v3 = vmul.f32 0.01, %v657_v0  ;;  %v1628_v4 = vsel %vm750_vm1, %v738_v2, -1e+30  ;;  %vm705_vm8 = vcmp.gt.f32.partialorder %v657_v0, 0.0  ;;  %v736_v6 = vsel %vm704_vm6, %v654_v58, %v720_v63 }
 0x1fb   : > { %779 = vmax.xlane.f32.xlu0 %v1628_v4  ;;  %v739_v5 = vsel %vm707_vm7, %v665_v61, %v723_v1  ;;  %v1638_v9 = vsel %vm750_vm1, %v736_v6, -1e+30 }
 0x1fc   : > { %v1633_v7 = vsel %vm750_vm1, %v739_v5, -1e+30  ;;  %v737_v8 = vsel %vm705_vm8, %v657_v0, %v721_v3 }
 0x1fd   : > { %781 = vmax.xlane.f32.xlu1 %v1633_v7  ;;  %v1643_v10 = vsel %vm750_vm1, %v737_v8, -1e+30 }
 0x1ff   : > { %775 = vmax.xlane.f32.xlu0 %v1638_v9 }
 0x201   : > { %777 = vmax.xlane.f32.xlu1 %v1643_v10 }
 0x204   : > { %v1197_v11 = vpop.f32.mrb[8].mxu1 }
 0x205   : > { %v678_v12 = vadd.f32 %v1197_v11, %v1593_v33  ;;  %v669_v13 = vpop.f32.mrb[9].mxu1 }
 0x206   : > { %v670_v14 = vadd.f32 %v1593_v33, %v669_v13  ;;  %v1198_v15 = vpop.f32.mrb[10].mxu1 }
 0x207   : > { %v726_v16 = vmul.f32 0.01, %v678_v12  ;;  %v681_v17 = vadd.f32 %v1198_v15, %v1593_v33  ;;  %v672_v18 = vpop.f32.mrb[11].mxu1  ;;  %vm710_vm9 = vcmp.gt.f32.partialorder %v678_v12, 0.0 }
 0x208   : > { %v724_v19 = vmul.f32 0.01, %v670_v14  ;;  %v673_v20 = vadd.f32 %v1593_v33, %v672_v18  ;;  %vm708_vm10 = vcmp.gt.f32.partialorder %v670_v14, 0.0 }
 0x209   : > { %v727_v21 = vmul.f32 0.01, %v681_v17  ;;  %v742_v22 = vsel %vm710_vm9, %v678_v12, %v726_v16  ;;  %vm711_vm11 = vcmp.gt.f32.partialorder %v681_v17, 0.0 }
 0x20a   : > { %v725_v23 = vmul.f32 0.01, %v673_v20  ;;  %v1652_v24 = vsel %vm750_vm1, %v742_v22, -1e+30  ;;  %vm709_vm12 = vcmp.gt.f32.partialorder %v673_v20, 0.0  ;;  %v740_v26 = vsel %vm708_vm10, %v670_v14, %v724_v19 }
 0x20b   : > { %787 = vmax.xlane.f32.xlu0 %v1652_v24  ;;  %v743_v25 = vsel %vm711_vm11, %v681_v17, %v727_v21  ;;  %v1662_v29 = vsel %vm750_vm1, %v740_v26, -1e+30 }
 0x20c   : > { %v1657_v27 = vsel %vm750_vm1, %v743_v25, -1e+30  ;;  %v741_v28 = vsel %vm709_vm12, %v673_v20, %v725_v23 }
 0x20d   : > { %789 = vmax.xlane.f32.xlu1 %v1657_v27  ;;  %v1667_v30 = vsel %vm750_vm1, %v741_v28, -1e+30 }
 0x20f   : > { %783 = vmax.xlane.f32.xlu0 %v1662_v29 }
 0x211   : > { %785 = vmax.xlane.f32.xlu1 %v1667_v30 }
 0x214   : > { %v1201_v31 = vpop.f32.mrb[12].mxu1 }
 0x215   : > { %v694_v32 = vadd.f32 %v1201_v31, %v1593_v33  ;;  %v685_v35 = vpop.f32.mrb[13].mxu1 }
 0x216   : > { %v686_v36 = vadd.f32 %v1593_v33, %v685_v35  ;;  %v1202_v37 = vpop.f32.mrb[14].mxu1 }
 0x217   : > { %v697_v38 = vadd.f32 %v1202_v37, %v1593_v33  ;;  %v688_v39 = vpop.f32.mrb[15].mxu1  ;;  %v730_v40 = vmul.f32 0.01, %v694_v32  ;;  %vm714_vm14 = vcmp.gt.f32.partialorder %v694_v32, 0.0 }
 0x218   : > { %v728_v41 = vmul.f32 0.01, %v686_v36  ;;  %v689_v42 = vadd.f32 %v1593_v33, %v688_v39  ;;  %vm712_vm13 = vcmp.gt.f32.partialorder %v686_v36, 0.0 }
 0x219   : > { %v731_v43 = vmul.f32 0.01, %v697_v38  ;;  %vm715_vm0 = vcmp.gt.f32.partialorder %v697_v38, 0.0  ;;  %v746_v49 = vsel %vm714_vm14, %v694_v32, %v730_v40 }
 0x21a   : > { %v729_v44 = vmul.f32 0.01, %v689_v42  ;;  %v744_v45 = vsel %vm712_vm13, %v686_v36, %v728_v41  ;;  %vm713_vm15 = vcmp.gt.f32.partialorder %v689_v42, 0.0  ;;  %v1686_v52 = vsel %vm750_vm1, %v746_v49, -1e+30 }
 0x21b   : > { %v1676_v46 = vsel %vm750_vm1, %v744_v45, -1e+30  ;;  %v747_v33 = vsel %vm715_vm0, %v697_v38, %v731_v43 }
 0x21c   : > { %791 = vmax.xlane.f32.xlu0 %v1676_v46  ;;  %v745_v47 = vsel %vm713_vm15, %v689_v42, %v729_v44  ;;  %v1691_v55 = vsel %vm750_vm1, %v747_v33, -1e+30 }
 0x21d   : > { %v1681_v51 = vsel %vm750_vm1, %v745_v47, -1e+30 }
 0x21e   : > { %793 = vmax.xlane.f32.xlu1 %v1681_v51 }
 0x220   : > { %795 = vmax.xlane.f32.xlu0 %v1686_v52 }
 0x222   : > { %797 = vmax.xlane.f32.xlu1 %v1691_v55 }
 0x278   : > { %v1694_v56 = vpop.xlane.xlu1 %771 }
 0x279   : > { %v801_v57 = vsub.f32 %v1604_v48, %v1694_v56  ;;  %v1698_v58 = vpop.xlane.xlu0 %767 }
 0x27a   : > { %v799_v59 = vsub.f32 %v1609_v50, %v1698_v58 }
 0x27b   : > { %v819_v60 = vmul.f32 1.442695, %v801_v57 }
 0x27c   : > { %v815_v61 = vmul.f32 1.442695, %v799_v59  ;;  %v1702_v62 = vpop.xlane.xlu1 %773 }
 0x27d   : > { %1292 = vpow2.f32 %v819_v60  ;;  %v802_v34 = vsub.f32 %v1614_v53, %v1702_v62  ;;  %v1706_v63 = vpop.xlane.xlu0 %769 }
 0x27e   : > { %v800_v0 = vsub.f32 %v1619_v54, %v1706_v63  ;;  %1294 = vpow2.f32 %v815_v61 }
 0x27f   : > { %v821_v1 = vmul.f32 1.442695, %v802_v34 }
 0x280   : > { %v817_v2 = vmul.f32 1.442695, %v800_v0 }
 0x281   : > { %1296 = vpow2.f32 %v821_v1 }
 0x282   : > { %1298 = vpow2.f32 %v817_v2 }
 0x287   : > { %v1293_v3 = vpop.eup %1292 }
 0x288   : > { %851 = vadd.xlane.f32.xlu0 %v1293_v3  ;;  %v1710_v5 = vpop.xlane.xlu0 %779  ;;  %v1295_v8 = vpop.eup %1294 }
 0x289   : > { %v805_v6 = vsub.f32 %v1628_v4, %v1710_v5 }
 0x28a   : > { %v1714_v11 = vpop.xlane.xlu1 %781 }
 0x28b   : > { %v1297_v12 = vpop.eup %1296  ;;  %v827_v13 = vmul.f32 1.442695, %v805_v6  ;;  %v806_v14 = vsub.f32 %v1633_v7, %v1714_v11 }
 0x28c   : > { %853 = vadd.xlane.f32.xlu1 %v1297_v12  ;;  %847 = vadd.xlane.f32.xlu0 %v1295_v8  ;;  %v1718_v15 = vpop.xlane.xlu0 %775  ;;  %v1299_v19 = vpop.eup %1298 }
 0x28d   : > { %1300 = vpow2.f32 %v827_v13  ;;  %v829_v16 = vmul.f32 1.442695, %v806_v14  ;;  %v803_v17 = vsub.f32 %v1638_v9, %v1718_v15 }
 0x28e   : > { %v1722_v18 = vpop.xlane.xlu1 %777 }
 0x28f   : > { %1302 = vpow2.f32 %v829_v16  ;;  %v823_v20 = vmul.f32 1.442695, %v803_v17  ;;  %v804_v21 = vsub.f32 %v1643_v10, %v1722_v18 }
 0x290   : > { %849 = vadd.xlane.f32.xlu1 %v1299_v19 }
 0x291   : > { %1304 = vpow2.f32 %v823_v20  ;;  %v825_v22 = vmul.f32 1.442695, %v804_v21 }
 0x293   : > { %1306 = vpow2.f32 %v825_v22 }
 0x297   : > { %v1301_v23 = vpop.eup %1300 }
 0x298   : > { %859 = vadd.xlane.f32.xlu0 %v1301_v23  ;;  %v1726_v25 = vpop.xlane.xlu0 %787 }
 0x299   : > { %v1303_v26 = vpop.eup %1302  ;;  %v809_v28 = vsub.f32 %v1652_v24, %v1726_v25 }
 0x29a   : > { %v1730_v31 = vpop.xlane.xlu1 %789  ;;  %861 = vadd.xlane.f32.xlu1 %v1303_v26 }
 0x29b   : > { %v1305_v32 = vpop.eup %1304  ;;  %v835_v35 = vmul.f32 1.442695, %v809_v28  ;;  %v810_v36 = vsub.f32 %v1657_v27, %v1730_v31 }
 0x29c   : > { %855 = vadd.xlane.f32.xlu0 %v1305_v32  ;;  %v1734_v37 = vpop.xlane.xlu0 %783 }
 0x29d   : > { %v1307_v38 = vpop.eup %1306  ;;  %1308 = vpow2.f32 %v835_v35  ;;  %v837_v39 = vmul.f32 1.442695, %v810_v36  ;;  %v807_v40 = vsub.f32 %v1662_v29, %v1734_v37 }
 0x29e   : > { %v1738_v41 = vpop.xlane.xlu1 %785  ;;  %857 = vadd.xlane.f32.xlu1 %v1307_v38 }
 0x29f   : > { %1310 = vpow2.f32 %v837_v39  ;;  %v831_v42 = vmul.f32 1.442695, %v807_v40  ;;  %v808_v43 = vsub.f32 %v1667_v30, %v1738_v41 }
 0x2a1   : > { %1312 = vpow2.f32 %v831_v42  ;;  %v833_v44 = vmul.f32 1.442695, %v808_v43 }
 0x2a3   : > { %1314 = vpow2.f32 %v833_v44 }
 0x2a7   : > { %v1309_v45 = vpop.eup %1308 }
 0x2a8   : > { %867 = vadd.xlane.f32.xlu0 %v1309_v45 }
 0x2a9   : > { %v1311_v47 = vpop.eup %1310  ;;  %v1742_v49 = vpop.xlane.xlu0 %791 }
 0x2aa   : > { %v811_v33 = vsub.f32 %v1676_v46, %v1742_v49  ;;  %869 = vadd.xlane.f32.xlu1 %v1311_v47 }
 0x2ab   : > { %v1313_v57 = vpop.eup %1312  ;;  %v1746_v59 = vpop.xlane.xlu1 %793 }
 0x2ac   : > { %v839_v60 = vmul.f32 1.442695, %v811_v33  ;;  %v812_v61 = vsub.f32 %v1681_v51, %v1746_v59  ;;  %863 = vadd.xlane.f32.xlu0 %v1313_v57 }
 0x2ad   : > { %v1315_v34 = vpop.eup %1314  ;;  %v1750_v0 = vpop.xlane.xlu0 %795 }
 0x2ae   : > { %1316 = vpow2.f32 %v839_v60  ;;  %v841_v1 = vmul.f32 1.442695, %v812_v61  ;;  %v813_v2 = vsub.f32 %v1686_v52, %v1750_v0  ;;  %865 = vadd.xlane.f32.xlu1 %v1315_v34 }
 0x2af   : > { %v1754_v3 = vpop.xlane.xlu1 %797 }
 0x2b0   : > { %1318 = vpow2.f32 %v841_v1  ;;  %v843_v6 = vmul.f32 1.442695, %v813_v2  ;;  %v814_v8 = vsub.f32 %v1691_v55, %v1754_v3 }
 0x2b2   : > { %1320 = vpow2.f32 %v843_v6  ;;  %v845_v12 = vmul.f32 1.442695, %v814_v8 }
 0x2b4   : > { %1322 = vpow2.f32 %v845_v12 }
 0x2b8   : > { %v1317_v13 = vpop.eup %1316 }
 0x2b9   : > { %871 = vadd.xlane.f32.xlu0 %v1317_v13 }
 0x2ba   : > { %v1319_v14 = vpop.eup %1318 }
 0x2bb   : > { %873 = vadd.xlane.f32.xlu1 %v1319_v14 }
 0x2bc   : > { %v1321_v16 = vpop.eup %1320 }
 0x2bd   : > { %875 = vadd.xlane.f32.xlu0 %v1321_v16 }
 0x2be   : > { %v1323_v17 = vpop.eup %1322 }
 0x2bf   : > { %877 = vadd.xlane.f32.xlu1 %v1323_v17 }
 0x315   : > { %v852_v19 = vpop.xlane.xlu0 %851 }
 0x316   : > { %1324 = vlog2.f32 %v852_v19 }
 0x319   : > { %v854_v20 = vpop.xlane.xlu1 %853  ;;  %v848_v21 = vpop.xlane.xlu0 %847 }
 0x31a   : > { %1326 = vlog2.f32 %v854_v20 }
 0x31b   : > { %1328 = vlog2.f32 %v848_v21 }
 0x31d   : > { %v850_v22 = vpop.xlane.xlu1 %849 }
 0x31e   : > { %1330 = vlog2.f32 %v850_v22 }
 0x320   : > { %v1325_v23 = vpop.eup %1324 }
 0x321   : > { %v884_v26 = vmul.f32 0.6931472, %v1325_v23 }
 0x323   : > { %v913_v28 = vadd.f32 %v884_v26, %v1694_v56 }
 0x324   : > { %v1327_v32 = vpop.eup %1326 }
 0x325   : > { %v1329_v35 = vpop.eup %1328  ;;  %v929_v36 = vsub.f32 %v1604_v48, %v913_v28  ;;  %v886_v38 = vmul.f32 0.6931472, %v1327_v32  ;;  %v860_v39 = vpop.xlane.xlu0 %859 }
 0x326   : > { %v880_v40 = vmul.f32 0.6931472, %v1329_v35  ;;  %1332 = vlog2.f32 %v860_v39 }
 0x327   : > { %945 = vst [vmem:[%s1763_s9 + $0x10] sm:$0xff] %v929_v36  ;;  %v914_v42 = vadd.f32 %v886_v38, %v1702_v62  ;;  %v862_v43 = vpop.xlane.xlu1 %861 }
 0x328   : > { %v1331_v44 = vpop.eup %1330  ;;  %v911_v56 = vadd.f32 %v880_v40, %v1698_v58  ;;  %1334 = vlog2.f32 %v862_v43 }
 0x329   : > { %v930_v48 = vsub.f32 %v1614_v53, %v914_v42  ;;  %v882_v45 = vmul.f32 0.6931472, %v1331_v44  ;;  %v856_v47 = vpop.xlane.xlu0 %855 }
 0x32a   : > { %v927_v33 = vsub.f32 %v1609_v50, %v911_v56  ;;  %1336 = vlog2.f32 %v856_v47 }
 0x32b   : > { %946 = vst [vmem:[%s1763_s9 + $0x18] sm:$0xff] %v930_v48  ;;  %v912_v57 = vadd.f32 %v882_v45, %v1706_v63  ;;  %v858_v60 = vpop.xlane.xlu1 %857 }
 0x32c   : > { %943 = vst [vmem:[%s1763_s9] sm:$0xff] %v927_v33  ;;  %1338 = vlog2.f32 %v858_v60 }
 0x32d   : > { %v928_v62 = vsub.f32 %v1619_v54, %v912_v57 }
 0x32f   : > { %944 = vst [vmem:[%s1763_s9 + $0x8] sm:$0xff] %v928_v62 }
 0x330   : > { %v1333_v61 = vpop.eup %1332 }
 0x331   : > { %v892_v58 = vmul.f32 0.6931472, %v1333_v61 }
 0x332   : > { %v1335_v34 = vpop.eup %1334 }
 0x333   : > { %v917_v53 = vadd.f32 %v892_v58, %v1710_v5  ;;  %v894_v1 = vmul.f32 0.6931472, %v1335_v34 }
 0x334   : > { %v1337_v2 = vpop.eup %1336 }
 0x335   : > { %v933_v50 = vsub.f32 %v1628_v4, %v917_v53  ;;  %v918_v6 = vadd.f32 %v894_v1, %v1714_v11  ;;  %v888_v63 = vmul.f32 0.6931472, %v1337_v2  ;;  %v868_v8 = vpop.xlane.xlu0 %867 }
 0x336   : > { %v1339_v12 = vpop.eup %1338  ;;  %1340 = vlog2.f32 %v868_v8 }
 0x337   : > { %949 = vst [vmem:[%s1763_s9 + $0x30] sm:$0xff] %v933_v50  ;;  %v934_v54 = vsub.f32 %v1633_v7, %v918_v6  ;;  %v915_v13 = vadd.f32 %v888_v63, %v1718_v15  ;;  %v890_v14 = vmul.f32 0.6931472, %v1339_v12  ;;  %v870_v16 = vpop.xlane.xlu1 %869 }
 0x338   : > { %1342 = vlog2.f32 %v870_v16 }
 0x339   : > { %950 = vst [vmem:[%s1763_s9 + $0x38] sm:$0xff] %v934_v54  ;;  %v931_v5 = vsub.f32 %v1638_v9, %v915_v13  ;;  %v916_v4 = vadd.f32 %v890_v14, %v1722_v18  ;;  %v864_v11 = vpop.xlane.xlu0 %863 }
 0x33a   : > { %1344 = vlog2.f32 %v864_v11 }
 0x33b   : > { %947 = vst [vmem:[%s1763_s9 + $0x20] sm:$0xff] %v931_v5  ;;  %v932_v17 = vsub.f32 %v1643_v10, %v916_v4  ;;  %v866_v19 = vpop.xlane.xlu1 %865 }
 0x33c   : > { %1346 = vlog2.f32 %v866_v19 }
 0x33d   : > { %948 = vst [vmem:[%s1763_s9 + $0x28] sm:$0xff] %v932_v17 }
 0x340   : > { %v1341_v7 = vpop.eup %1340 }
 0x341   : > { %v900_v20 = vmul.f32 0.6931472, %v1341_v7 }
 0x342   : > { %v1343_v15 = vpop.eup %1342 }
 0x343   : > { %v921_v21 = vadd.f32 %v900_v20, %v1726_v25  ;;  %v902_v22 = vmul.f32 0.6931472, %v1343_v15 }
 0x344   : > { %v1345_v23 = vpop.eup %1344 }
 0x345   : > { %v937_v9 = vsub.f32 %v1652_v24, %v921_v21  ;;  %v922_v18 = vadd.f32 %v902_v22, %v1730_v31  ;;  %v896_v26 = vmul.f32 0.6931472, %v1345_v23 }
 0x346   : > { %v1347_v28 = vpop.eup %1346  ;;  %v872_v32 = vpop.xlane.xlu0 %871 }
 0x347   : > { %953 = vst [vmem:[%s1763_s9 + $0x50] sm:$0xff] %v937_v9  ;;  %v938_v10 = vsub.f32 %v1657_v27, %v922_v18  ;;  %v919_v35 = vadd.f32 %v896_v26, %v1734_v37  ;;  %v898_v36 = vmul.f32 0.6931472, %v1347_v28  ;;  %1348 = vlog2.f32 %v872_v32 }
 0x348   : > { %v874_v38 = vpop.xlane.xlu1 %873 }
 0x349   : > { %954 = vst [vmem:[%s1763_s9 + $0x58] sm:$0xff] %v938_v10  ;;  %v935_v25 = vsub.f32 %v1662_v29, %v919_v35  ;;  %v920_v24 = vadd.f32 %v898_v36, %v1738_v41  ;;  %1350 = vlog2.f32 %v874_v38 }
 0x34a   : > { %v876_v39 = vpop.xlane.xlu0 %875 }
 0x34b   : > { %951 = vst [vmem:[%s1763_s9 + $0x40] sm:$0xff] %v935_v25  ;;  %v936_v31 = vsub.f32 %v1667_v30, %v920_v24  ;;  %1352 = vlog2.f32 %v876_v39 }
 0x34c   : > { %v878_v40 = vpop.xlane.xlu1 %877 }
 0x34d   : > { %952 = vst [vmem:[%s1763_s9 + $0x48] sm:$0xff] %v936_v31  ;;  %1354 = vlog2.f32 %v878_v40 }
 0x351   : > { %v1349_v27 = vpop.eup %1348 }
 0x352   : > { %v904_v37 = vmul.f32 0.6931472, %v1349_v27 }
 0x353   : > { %v1351_v42 = vpop.eup %1350 }
 0x354   : > { %v923_v29 = vadd.f32 %v904_v37, %v1742_v49  ;;  %v906_v43 = vmul.f32 0.6931472, %v1351_v42 }
 0x355   : > { %v1353_v41 = vpop.eup %1352 }
 0x356   : > { %v939_v44 = vsub.f32 %v1676_v46, %v923_v29  ;;  %v924_v56 = vadd.f32 %v906_v43, %v1746_v59  ;;  %v908_v30 = vmul.f32 0.6931472, %v1353_v41 }
 0x357   : > { %v1355_v48 = vpop.eup %1354 }
 0x358   : > { %955 = vst [vmem:[%s1763_s9 + $0x60] sm:$0xff] %v939_v44  ;;  %v940_v45 = vsub.f32 %v1681_v51, %v924_v56  ;;  %v925_v47 = vadd.f32 %v908_v30, %v1750_v0  ;;  %v910_v33 = vmul.f32 0.6931472, %v1355_v48 }
 0x35a   : > { %956 = vst [vmem:[%s1763_s9 + $0x68] sm:$0xff] %v940_v45  ;;  %v941_v49 = vsub.f32 %v1686_v52, %v925_v47  ;;  %v926_v46 = vadd.f32 %v910_v33, %v1754_v3 }
 0x35c   : > { %957 = vst [vmem:[%s1763_s9 + $0x70] sm:$0xff] %v941_v49  ;;  %v942_v51 = vsub.f32 %v1691_v55, %v926_v46 }
 0x35e   : > { %958 = vst [vmem:[%s1763_s9 + $0x78] sm:$0xff] %v942_v51 }
 0x35f   : > { %1369 = shalt.err (!%p1366_p3)
}
 0x360   : > { %s1370_s27 = scalar_lea.hbm %s1813_s13, 2048  ;;  %s1374_s30 = scalar_lea.hbm %s1867_s4, 4096 }
 0x361   : > { %p1371_p4 = scmp.ne.s32.totalorder %s1813_s13, %s1370_s27  ;;  %p1375_p9 = scmp.lt.u32.totalorder %s1813_s13, %s1867_s4 }
 0x362   : > { %p1376_p10 = scmp.lt.u32.totalorder %s1374_s30, %s1370_s27  ;;  %p1378_p12 = scmp.lt.u32.totalorder %s1370_s27, %s1813_s13 }
 0x363   : > { %p1372_p7 = pnand %p1371_p4, %p1486_p5 }
 0x364   : > { %p1377_p11 = por %p1376_p10, %p1375_p9 }
 0x365   : > { %p1373_p8 = pneg %p1372_p7 }
 0x366   : > { %p1379_p13 = por %p1378_p12, %p1377_p11 }
 0x368   : > { %p1380_p0 = pnand %p1379_p13, %p1373_p8 }
 0x36a   : > { %1383 = shalt.err (!%p1380_p0)
}
 0x36b   : > { %s1421_s8 = smov 128   ;;  %s1422_s9 = smov 8  }
 0x36c   : > { %1203 = dma.vmem_to_hbm [thread:$0]  (%p1486_p5), %s1815_s11, 2048, %s1813_s13, %s1822_s19, %s1421_s8, %s1421_s8, %s1422_s9  }
 0x36d PF: > { %p1209_p1 = scmp.ge.s32.totalorder %s1418_s18, 2  ;;  %s988_s10 = sand.u32 1, %s1406_s15  }
 0x36e   : > { %s989_s29 = scalar_lea.sflag [#allocation3], %s988_s10 }
 0x36f   : > { %p1206_p2 = pnand %p1209_p1, %p1490_p6 }
 0x371   : > { %1401 = dma.done.wait (!%p1206_p2), %s989_s29, 2048  }
 0x372   : > { %1403 = vsyncadd (!%p1206_p2), %s989_s29, 4294965248  ;;  %p14_p3 = scmp.ge.s32.totalorder %s1473_s21, 4   ;;  %s1870_s15 = smov %s1410_s16 }
 0x373   : > { %s1871_s16 = smov %s1414_s17  ;;  %s1872_s17 = smov %s1484_s24 }
 0x374   : > { %s1873_s18 = smov %s1473_s21  ;;  %16 = sbr.rel (!%p14_p3) target bundleno = 3 (0x3), region = 71 }
 0x37b   :  { %994 = vsyncpa [#allocation3], 1 }
 0x37c   :  { %996 = vsyncpa [#allocation3 + $0x1], 1 }

// kernel: gnn_forward_padded.2
= control target key start
LH: loop header
LB: loop body
LE: loop exit
PB: predicated region body
PF: predicated region fallthrough
CT: control target
= control target key end

     0   :  { %9 = vsyncpa [#allocation3], 0  ;;  %s1711_s0 = inlined_call_operand.hbm [shape: bf16[256,256], index: 0, kind: input, shape index: {}]   ;;  %s1712_s1 = inlined_call_operand.hbm [shape: bf16[256,128], index: 1, kind: input, shape index: {}]   ;;  %s1713_s2 = inlined_call_operand.hbm [shape: bf16[128,128], index: 2, kind: input, shape index: {}]   ;;  %s1714_s3 = inlined_call_operand.vmem [shape: f32[1,128], index: 3, kind: input, shape index: {}]   ;;  %s1715_s4 = inlined_call_operand.vmem [shape: bf16[256,128], index: 4, kind: output, shape index: {}]  }
   0x1   :  { %11 = vsyncpa [#allocation3 + $0x1], 0 }
   0x2   :  { %12 = vsyncpa [#allocation5], 0  ;;  %s1484_s15 = smov 0   ;;  %s1486_s16 = smov 0  }
   0x3   :  { %s1488_s17 = smov 0   ;;  %s1490_s18 = smov 0  }
   0x4 LB: > { %s962_s19 = sadd.s32 4294967295, %s1450_s18   ;;  %p38_p0 = scmp.ne.s32.totalorder %s1442_s16, %s1438_s15  ;;  %s1450_s18 = sphi %s1490_s18, %s1731_s18   ;;  %s1446_s17 = sphi %s1488_s17, %s1730_s17   ;;  %s1442_s16 = sphi %s1486_s16, %s1729_s16   ;;  %s1438_s15 = sphi %s1484_s15, %s1728_s15  }
   0x5   : > { %p1506_p1 = scmp.eq.s32.totalorder %s962_s19, 0  ;;  %p964_p2 = scmp.ge.s32.totalorder %s1450_s18, 1 }
   0x6   : > { %p138_p3 = scmp.lt.s32.totalorder %s1450_s18, 3  ;;  %s1452_s23 = smov [#allocation4]  }
   0x7   : > { %s1720_s20 = scalar_select %p1506_p1, 1, 0 }
   0x8   : > { %p1514_p4 = por %p1506_p1, %p38_p0  ;;  %p1518_p5 = pnand %p964_p2, %p138_p3 }
   0x9   : > { %s150_s24 = sshll.u32 %s1452_s23, 4  ;;  %s1453_s26 = smov [#allocation6]   ;;  %s151_s24 = int_to_ptr.vmem [resolvable:$true] %s150_s24 }
   0xa   : > { %s1721_s21 = scalar_select %p1514_p4, 1, 0 }
   0xb   : > { %s1722_s22 = scalar_select %p1518_p5, 1, 0 }
   0xc   : > { %p1224_p6 = pneg %p1518_p5  ;;  %s163_s27 = sshll.u32 %s1453_s26, 4  ;;  %s1530_s27 = int_to_ptr.vmem [resolvable:$true] %s163_s27 }
   0xd   : > { %s1326_s30 = scalar_lea.hbm %s1712_s1, 2048 }
   0xe   : > { %p1526_p7 = pnand %p1224_p6, %p1506_p1  ;;  %p1327_p8 = scmp.ne.s32.totalorder %s1712_s1, %s1326_s30 }
   0xf   : > { %p1333_p12 = scmp.lt.u32.totalorder %s1326_s30, %s1712_s1 }
  0x10   : > { %p1328_p9 = pneg %p1526_p7 }
  0x12   : > { %p1329_p10 = pnand %p1328_p9, %p1327_p8 }
  0x14   : > { %p1330_p11 = pneg %p1329_p10 }
  0x16   : > { %p1335_p13 = pnand %p1333_p12, %p1330_p11 }
  0x18   : > { %1338 = shalt.err (!%p1335_p13)
}
  0x19   : > { %s1339_s9 = scalar_lea.vmem %s151_s24, 2048  ;;  %p1347_p6 = scmp.lt.s32.totalorder %s151_s24, %s151_s24 }
  0x1a   : > { %p1340_p0 = scmp.ne.s32.totalorder %s151_s24, %s1339_s9  ;;  %p1348_p1 = scmp.lt.s32.totalorder %s1339_s9, %s1339_s9 }
  0x1c   : > { %p1342_p2 = pnand %p1340_p0, %p1328_p9  ;;  %p1349_p4 = por %p1348_p1, %p1347_p6 }
  0x1e   : > { %p1343_p3 = pneg %p1342_p2 }
  0x20   : > { %p1350_p5 = pnand %p1349_p4, %p1343_p3 }
  0x22   : > { %1353 = shalt.err (!%p1350_p5)
}
  0x23   : > { %s1454_s10 = smov 64   ;;  %s1455_s11 = smov 4  }
  0x24   : > { %1227 = dma.hbm_to_vmem [thread:$0]  (!%p1526_p7), %s1712_s1, 2048, %s151_s24, [#allocation5], %s1454_s10, %s1454_s10, %s1455_s11  }
  0x25   : > { %s1354_s23 = scalar_lea.hbm %s1713_s2, 1024 }
  0x26   : > { %p1355_p8 = scmp.ne.s32.totalorder %s1713_s2, %s1354_s23  ;;  %p1361_p5 = scmp.lt.u32.totalorder %s1354_s23, %s1713_s2 }
  0x28   : > { %p1357_p1 = pnand %p1355_p8, %p1328_p9 }
  0x2a   : > { %p1358_p4 = pneg %p1357_p1 }
  0x2c   : > { %p1363_p10 = pnand %p1361_p5, %p1358_p4 }
  0x2e   : > { %1366 = shalt.err (!%p1363_p10)
}
  0x2f   : > { %s1367_s24 = scalar_lea.vmem %s1530_s27, 1024  ;;  %p1375_p0 = scmp.lt.s32.totalorder %s1530_s27, %s1530_s27 }
  0x30   : > { %p1368_p11 = scmp.ne.s32.totalorder %s1530_s27, %s1367_s24  ;;  %p1376_p2 = scmp.lt.s32.totalorder %s1367_s24, %s1367_s24 }
  0x32   : > { %p1370_p12 = pnand %p1368_p11, %p1328_p9  ;;  %p1377_p3 = por %p1376_p2, %p1375_p0 }
  0x34   : > { %p1371_p13 = pneg %p1370_p12 }
  0x36   : > { %p1378_p6 = pnand %p1377_p3, %p1371_p13 }
  0x38   : > { %1381 = shalt.err (!%p1378_p6)
}
  0x39   : > { %1230 = dma.hbm_to_vmem [thread:$0]  (!%p1526_p7), %s1713_s2, 1024, %s1530_s27, [#allocation5], %s1454_s10, %s1454_s10, %s1455_s11  }
  0x3a   : > { %s1580_s7 = sadd.s32 1, %s1450_s18   ;;  %s25_s8 = sadd.s32 1, %s1446_s17 }
  0x3b   : > { %s22_s25 = ssub.s32 %s1450_s18, %s1580_s7  ;;  %p32_p9 = scmp.ne.s32.totalorder %s1446_s17, %s1442_s16 }
  0x3c   : > { %p23_p8 = scmp.eq.s32.totalorder %s22_s25, 0  ;;  %p33_p1 = scmp.eq.s32.totalorder %s1450_s18, 0 }
  0x3d   : > { %p1237_p4 = scmp.lt.s32.totalorder %s1450_s18, 2  ;;  %s180_s9 = sand.u32 1, %s1446_s17  }
  0x3e   : > { %s1591_s12 = scalar_select %p23_p8, %s1446_s17, %s25_s8  }
  0x3f   : > { %p34_p5 = por %p33_p1, %p32_p9  ;;  %s968_s13 = sshll.u32 %s180_s9, 7 }
  0x40   : > { %s1038_s14 = sshll.u32 %s1450_s18, 11  ;;  %s184_s27 = scalar_lea.vmem [#allocation2], %s968_s13 }
  0x41   : > { %s1597_s26 = scalar_lea.hbm %s1711_s0, %s1038_s14  ;;  %s192_s10 = sshll.u32 %s184_s27, 4  ;;  %s1603_s10 = int_to_ptr.vmem [resolvable:$true] %s192_s10 }
  0x42   : > { %p1599_p7 = pnand %p1237_p4, %p34_p5  ;;  %s1605_s28 = scalar_lea.sflag [#allocation3], %s180_s9 }
  0x43   : > { %s1382_s29 = scalar_lea.hbm %s1597_s26, 2048  ;;  %s1387_s5 = scalar_lea.hbm %s1711_s0, 4096 }
  0x44   : > { %p1383_p10 = scmp.ne.s32.totalorder %s1597_s26, %s1382_s29  ;;  %p1384_p11 = pneg %p1599_p7 }
  0x45   : > { %p1388_p0 = scmp.lt.u32.totalorder %s1597_s26, %s1711_s0  ;;  %p1389_p2 = scmp.lt.u32.totalorder %s1387_s5, %s1382_s29 }
  0x46   : > { %p1385_p12 = pnand %p1384_p11, %p1383_p10  ;;  %p1391_p6 = scmp.lt.u32.totalorder %s1382_s29, %s1597_s26 }
  0x47   : > { %p1390_p3 = por %p1389_p2, %p1388_p0 }
  0x48   : > { %p1386_p13 = pneg %p1385_p12 }
  0x49   : > { %p1392_p9 = por %p1391_p6, %p1390_p3 }
  0x4b   : > { %p1393_p8 = pnand %p1392_p9, %p1386_p13 }
  0x4d   : > { %1396 = shalt.err (!%p1393_p8)
}
  0x4e   : > { %s1397_s25 = scalar_lea.vmem %s1603_s10, 2048  ;;  %s1456_s9 = smov [#allocation2]  }
  0x4f   : > { %p1398_p1 = scmp.ne.s32.totalorder %s1603_s10, %s1397_s25  ;;  %s1402_s13 = sshll.u32 %s1456_s9, 4  ;;  %s1403_s13 = int_to_ptr.vmem [resolvable:$false] %s1402_s13 }
  0x50   : > { %s1404_s14 = scalar_lea.vmem %s1403_s13, 4096  ;;  %p1405_p10 = scmp.lt.s32.totalorder %s1603_s10, %s1403_s13 }
  0x51   : > { %p1400_p4 = pnand %p1398_p1, %p1384_p11  ;;  %p1406_p12 = scmp.lt.s32.totalorder %s1404_s14, %s1397_s25 }
  0x53   : > { %p1401_p5 = pneg %p1400_p4  ;;  %p1407_p0 = por %p1406_p12, %p1405_p10 }
  0x55   : > { %p1408_p2 = pnand %p1407_p0, %p1401_p5 }
  0x57   : > { %1411 = shalt.err (!%p1408_p2)
}
  0x58   : > { %s1457_s15 = smov 128   ;;  %s1458_s23 = smov 8  }
  0x59   : > { %1234 = dma.hbm_to_vmem [thread:$0]  (!%p1599_p7), %s1597_s26, 2048, %s1603_s10, %s1605_s28, %s1457_s15, %s1457_s15, %s1458_s23  }
  0x5a   : > { %p1725_p11 = scmp.ne.s32.totalorder %s1722_s22, 0 }
  0x5b   : > { %s206_s27 = sand.u32 (!%p1725_p11), 1, %s1442_s16   ;;  %p1726_p13 = scmp.ne.s32.totalorder (!%p1725_p11), %s1721_s21, 0 }
  0x5c   : > { %204 = sbr.rel (%p1725_p11) target bundleno = 634 (0x27a), region = 36  ;;  %s973_s29 = sshll.u32 (!%p1725_p11), %s206_s27, 7 }
  0x5d   : > { %s207_s30 = scalar_lea.sflag (!%p1725_p11), [#allocation3], %s206_s27  ;;  %s1636_s24 = scalar_lea.vmem (!%p1725_p11), [#allocation2], %s973_s29 }
  0x63   : > { %1429 = dma.done.wait (%p1726_p13), %s207_s30, 2048  }
  0x64   : > { %1431 = vsyncadd (%p1726_p13), %s207_s30, 4294965248  ;;  %p1727_p3 = scmp.ne.s32.totalorder %s1720_s20, 0 }
  0x66   : > { %1433 = dma.done.wait (%p1727_p3), [#allocation5], 3072  }
  0x67   : > { %1435 = vsyncadd (%p1727_p3), [#allocation5], 4294964224  ;;  %v1278_v0 = vld [vmem:[#allocation4 + $0x40] sm:$0xff]   ;;  %v1280_v2 = vld [vmem:[#allocation4 + $0x48] sm:$0xff]   ;;  %s976_s20 = sshll.u32 %s962_s19, 4 }
  0x68   : > { %v1279_v1 = vld [vmem:[#allocation4] sm:$0xff]   ;;  %1102 = vmatprep.subr.bf16.mxu0 %v1278_v0  ;;  %v1281_v3 = vld [vmem:[#allocation4 + $0x8] sm:$0xff]   ;;  %v1282_v4 = vld [vmem:[#allocation4 + $0x50] sm:$0xff]   ;;  %p245_p7 = scmp.lt.s32.totalorder %s976_s20, 31 }
  0x69   : > { %1103 = vmatpush3.bf16.msra.mxu0 %v1279_v1  ;;  %v1283_v5 = vld [vmem:[#allocation4 + $0x10] sm:$0xff]   ;;  %v1284_v6 = vld [vmem:[#allocation4 + $0x58] sm:$0xff]   ;;  %v1286_v8 = vld [vmem:[#allocation4 + $0x60] sm:$0xff]  }
  0x6a   : > { %1104 = vmatprep.subr.bf16.mxu0 %v1280_v2  ;;  %v1285_v7 = vld [vmem:[#allocation4 + $0x18] sm:$0xff]   ;;  %v1287_v9 = vld [vmem:[#allocation4 + $0x20] sm:$0xff]   ;;  %v1288_v10 = vld [vmem:[#allocation4 + $0x68] sm:$0xff]   ;;  %s1733_s20 = smov (!%p245_p7, %s976_s20), 31 }
  0x6b   : > { %v1296_v11 = vld [vmem:[%s1636_s24 + $0x4] ss:$8 sps:$4 sm:$0xff]   ;;  %v1290_v13 = vld [vmem:[#allocation4 + $0x70] sm:$0xff]   ;;  %v1292_v15 = vld [vmem:[#allocation4 + $0x78] sm:$0xff]   ;;  %s977_s18 = sshll.u32 %s1733_s20, 2 }
  0x6c   : > { %v1289_v12 = vld [vmem:[#allocation4 + $0x28] sm:$0xff]   ;;  %507 = vmatprep.mubr.bf16.mxu0 %v1296_v11  ;;  %v1291_v14 = vld [vmem:[#allocation4 + $0x30] sm:$0xff]   ;;  %v1293_v16 = vld [vmem:[#allocation4 + $0x38] sm:$0xff]   ;;  %s1676_s10 = scalar_lea.vmem %s1715_s4, %s977_s18 }
  0x6d   : > { %1105 = vmatpush3.bf16.msra.mxu0 %v1281_v3  ;;  %v1318_v17 = vld [vmem:[#allocation6] sm:$0xff]   ;;  %v1319_v19 = vld [vmem:[#allocation6 + $0x8] sm:$0xff]   ;;  %v1297_v20 = vld [vmem:[%s1636_s24 + $0x14] ss:$8 sps:$4 sm:$0xff]  }
  0x6e   : > { %1106 = vmatprep.subr.bf16.mxu0 %v1282_v4  ;;  %v1294_v18 = vld [vmem:[%s1636_s24] ss:$8 sps:$4 sm:$0xff]   ;;  %1182 = vmatprep.subr.bf16.mxu1 %v1318_v17  ;;  %v1320_v21 = vld [vmem:[#allocation6 + $0x10] sm:$0xff]   ;;  %v1321_v22 = vld [vmem:[#allocation6 + $0x18] sm:$0xff]  }
  0x6f   : > { %1183 = vmatpush3.bf16.msra.mxu1 %v1318_v17  ;;  %v1299_v23 = vld [vmem:[%s1636_s24 + $0x10] ss:$8 sps:$4 sm:$0xff]   ;;  %v1300_v24 = vld [vmem:[%s1636_s24 + $0x24] ss:$8 sps:$4 sm:$0xff]   ;;  %v1302_v25 = vld [vmem:[%s1636_s24 + $0x20] ss:$8 sps:$4 sm:$0xff]  }
  0x70   : > { %1184 = vmatprep.subr.bf16.mxu1 %v1319_v19  ;;  %v1303_v26 = vld [vmem:[%s1636_s24 + $0x34] ss:$8 sps:$4 sm:$0xff]   ;;  %v1305_v27 = vld [vmem:[%s1636_s24 + $0x30] ss:$8 sps:$4 sm:$0xff]   ;;  %v1306_v28 = vld [vmem:[%s1636_s24 + $0x44] ss:$8 sps:$4 sm:$0xff]  }
  0x71   : > { %1107 = vmatpush3.bf16.msra.mxu0 %v1283_v5  ;;  %v1308_v29 = vld [vmem:[%s1636_s24 + $0x40] ss:$8 sps:$4 sm:$0xff]   ;;  %v1309_v30 = vld [vmem:[%s1636_s24 + $0x54] ss:$8 sps:$4 sm:$0xff]   ;;  %v1311_v31 = vld [vmem:[%s1636_s24 + $0x50] ss:$8 sps:$4 sm:$0xff]  }
  0x72   : > { %1108 = vmatprep.subr.bf16.mxu0 %v1284_v6  ;;  %v1312_v32 = vld [vmem:[%s1636_s24 + $0x64] ss:$8 sps:$4 sm:$0xff]   ;;  %v1314_v33 = vld [vmem:[%s1636_s24 + $0x60] ss:$8 sps:$4 sm:$0xff]   ;;  %v1315_v34 = vld [vmem:[%s1636_s24 + $0x74] ss:$8 sps:$4 sm:$0xff]  }
  0x73   : > { %1185 = vmatpush3.bf16.msra.mxu1 %v1319_v19  ;;  %v1317_v35 = vld [vmem:[%s1636_s24 + $0x70] ss:$8 sps:$4 sm:$0xff]   ;;  %v1322_v36 = vld [vmem:[#allocation6 + $0x20] sm:$0xff]   ;;  %v1323_v37 = vld [vmem:[#allocation6 + $0x28] sm:$0xff]  }
  0x74   : > { %1186 = vmatprep.subr.bf16.mxu1 %v1320_v21  ;;  %v1324_v38 = vld [vmem:[#allocation6 + $0x30] sm:$0xff]   ;;  %v1325_v39 = vld [vmem:[#allocation6 + $0x38] sm:$0xff]  }
  0x75   : > { %1109 = vmatpush3.bf16.msra.mxu0 %v1285_v7 }
  0x76   : > { %1110 = vmatprep.subr.bf16.mxu0 %v1286_v8 }
  0x77   : > { %1187 = vmatpush3.bf16.msra.mxu1 %v1320_v21 }
  0x78   : > { %1188 = vmatprep.subr.bf16.mxu1 %v1321_v22 }
  0x79   : > { %1111 = vmatpush3.bf16.msra.mxu0 %v1287_v9 }
  0x7a   : > { %1112 = vmatprep.subr.bf16.mxu0 %v1288_v10 }
  0x7b   : > { %1189 = vmatpush3.bf16.msra.mxu1 %v1321_v22 }
  0x7c   : > { %1190 = vmatprep.subr.bf16.mxu1 %v1322_v36 }
  0x7d   : > { %1113 = vmatpush3.bf16.msra.mxu0 %v1289_v12 }
  0x7e   : > { %1114 = vmatprep.subr.bf16.mxu0 %v1290_v13 }
  0x7f   : > { %1191 = vmatpush3.bf16.msra.mxu1 %v1322_v36 }
  0x80   : > { %1192 = vmatprep.subr.bf16.mxu1 %v1323_v37 }
  0x81   : > { %1115 = vmatpush3.bf16.msra.mxu0 %v1291_v14 }
  0x82   : > { %1116 = vmatprep.subr.bf16.mxu0 %v1292_v15 }
  0x83   : > { %1193 = vmatpush3.bf16.msra.mxu1 %v1323_v37 }
  0x84   : > { %1194 = vmatprep.subr.bf16.mxu1 %v1324_v38 }
  0x85   : > { %1117 = vmatpush3.bf16.msra.mxu0 %v1293_v16 }
  0x87   : > { %1195 = vmatpush3.bf16.msra.mxu1 %v1324_v38 }
  0x88   : > { %508 = vmatmul.mubr.bf16.vlgmr.msra.gmra.mrb[0].mxu0 %v1294_v18  ;;  %1196 = vmatprep.subr.bf16.mxu1 %v1325_v39 }
  0x89   : > { %515 = vmatprep.mubr.bf16.mxu0 %v1297_v20 }
  0x8b   : > { %1197 = vmatpush3.bf16.msra.mxu1 %v1325_v39 }
  0x90   : > { %516 = vmatmul.mubr.bf16.gmra.mrb[4].mxu0 %v1299_v23 }
  0x91   : > { %523 = vmatprep.mubr.bf16.mxu0 %v1300_v24 }
  0x98   : > { %524 = vmatmul.mubr.bf16.gmra.mrb[8].mxu0 %v1302_v25 }
  0x99   : > { %531 = vmatprep.mubr.bf16.mxu0 %v1303_v26 }
  0xa0   : > { %532 = vmatmul.mubr.bf16.gmra.mrb[12].mxu0 %v1305_v27 }
  0xa1   : > { %539 = vmatprep.mubr.bf16.mxu0 %v1306_v28 }
  0xa8   : > { %540 = vmatmul.mubr.bf16.gmra.mrb[16].mxu0 %v1308_v29 }
  0xa9   : > { %547 = vmatprep.mubr.bf16.mxu0 %v1309_v30 }
  0xb0   : > { %548 = vmatmul.mubr.bf16.gmra.mrb[20].mxu0 %v1311_v31 }
  0xb1   : > { %555 = vmatprep.mubr.bf16.mxu0 %v1312_v32  ;;  %v1667_v32 = vld [vmem:[%s1714_s3] ss:$0 sm:$0xff] }
  0xb8   : > { %556 = vmatmul.mubr.bf16.gmra.mrb[24].mxu0 %v1314_v33 }
  0xb9   : > { %563 = vmatprep.mubr.bf16.mxu0 %v1315_v34 }
  0xc0   : > { %564 = vmatmul.mubr.bf16.gmra.mrb[28].mxu0 %v1317_v35 }
 0x15b   : > { %v1118_v40 = vpop.f32.mrb[0].mxu0 }
 0x15c   : > { %v1119_v41 = vpop.f32.mrb[1].mxu0 }
 0x15d   : > { %v1120_v42 = vadd.f32 %v1119_v41, %v1118_v40  ;;  %v1121_v43 = vpop.f32.mrb[2].mxu0 }
 0x15e   : > { %v1122_v44 = vpop.f32.mrb[3].mxu0 }
 0x15f   : > { %v1123_v45 = vadd.f32 %v1122_v44, %v1121_v43 }
 0x161   : > { %v572_v46 = vpack.c.bf16 %v1123_v45, %v1120_v42 }
 0x163   : > { %v1124_v47 = vpop.f32.mrb[4].mxu0  ;;  %1198 = vmatprep.mubr.bf16.mxu1 %v572_v46 }
 0x164   : > { %v1125_v48 = vpop.f32.mrb[5].mxu0 }
 0x165   : > { %v1126_v49 = vadd.f32 %v1125_v48, %v1124_v47  ;;  %v1127_v50 = vpop.f32.mrb[6].mxu0 }
 0x166   : > { %v1128_v51 = vpop.f32.mrb[7].mxu0 }
 0x167   : > { %v1129_v52 = vadd.f32 %v1128_v51, %v1127_v50 }
 0x169   : > { %v573_v53 = vpack.c.bf16 %v1129_v52, %v1126_v49 }
 0x16b   : > { %v1130_v54 = vpop.f32.mrb[8].mxu0  ;;  %1199 = vmatmul.mubr.bf16.vlgmr.msra.gmra.mrb[0].mxu1 %v573_v53 }
 0x16c   : > { %v1131_v55 = vpop.f32.mrb[9].mxu0 }
 0x16d   : > { %v1132_v56 = vadd.f32 %v1131_v55, %v1130_v54  ;;  %v1133_v57 = vpop.f32.mrb[10].mxu0 }
 0x16e   : > { %v1134_v58 = vpop.f32.mrb[11].mxu0 }
 0x16f   : > { %v1135_v59 = vadd.f32 %v1134_v58, %v1133_v57 }
 0x171   : > { %v574_v60 = vpack.c.bf16 %v1135_v59, %v1132_v56 }
 0x173   : > { %v1136_v61 = vpop.f32.mrb[12].mxu0  ;;  %1202 = vmatprep.mubr.bf16.mxu1 %v574_v60 }
 0x174   : > { %v1137_v62 = vpop.f32.mrb[13].mxu0 }
 0x175   : > { %v1138_v63 = vadd.f32 %v1137_v62, %v1136_v61  ;;  %v1139_v0 = vpop.f32.mrb[14].mxu0 }
 0x176   : > { %v1140_v1 = vpop.f32.mrb[15].mxu0 }
 0x177   : > { %v1141_v2 = vadd.f32 %v1140_v1, %v1139_v0 }
 0x179   : > { %v575_v3 = vpack.c.bf16 %v1141_v2, %v1138_v63 }
 0x17b   : > { %v1142_v4 = vpop.f32.mrb[16].mxu0  ;;  %1203 = vmatmul.mubr.bf16.gmra.mrb[4].mxu1 %v575_v3 }
 0x17c   : > { %v1143_v5 = vpop.f32.mrb[17].mxu0 }
 0x17d   : > { %v1144_v6 = vadd.f32 %v1143_v5, %v1142_v4  ;;  %v1145_v7 = vpop.f32.mrb[18].mxu0 }
 0x17e   : > { %v1146_v8 = vpop.f32.mrb[19].mxu0 }
 0x17f   : > { %v1147_v9 = vadd.f32 %v1146_v8, %v1145_v7 }
 0x181   : > { %v576_v10 = vpack.c.bf16 %v1147_v9, %v1144_v6 }
 0x183   : > { %v1148_v11 = vpop.f32.mrb[20].mxu0  ;;  %1206 = vmatprep.mubr.bf16.mxu1 %v576_v10 }
 0x184   : > { %v1149_v12 = vpop.f32.mrb[21].mxu0 }
 0x185   : > { %v1150_v13 = vadd.f32 %v1149_v12, %v1148_v11  ;;  %v1151_v14 = vpop.f32.mrb[22].mxu0 }
 0x186   : > { %v1152_v15 = vpop.f32.mrb[23].mxu0 }
 0x187   : > { %v1153_v16 = vadd.f32 %v1152_v15, %v1151_v14 }
 0x189   : > { %v577_v17 = vpack.c.bf16 %v1153_v16, %v1150_v13 }
 0x18b   : > { %v1154_v18 = vpop.f32.mrb[24].mxu0  ;;  %1207 = vmatmul.mubr.bf16.gmra.mrb[8].mxu1 %v577_v17 }
 0x18c   : > { %v1155_v19 = vpop.f32.mrb[25].mxu0 }
 0x18d   : > { %v1156_v20 = vadd.f32 %v1155_v19, %v1154_v18  ;;  %v1157_v21 = vpop.f32.mrb[26].mxu0 }
 0x18e   : > { %v1158_v22 = vpop.f32.mrb[27].mxu0 }
 0x18f   : > { %v1159_v23 = vadd.f32 %v1158_v22, %v1157_v21 }
 0x191   : > { %v578_v24 = vpack.c.bf16 %v1159_v23, %v1156_v20 }
 0x193   : > { %v1160_v25 = vpop.f32.mrb[28].mxu0  ;;  %1210 = vmatprep.mubr.bf16.mxu1 %v578_v24 }
 0x194   : > { %v1161_v26 = vpop.f32.mrb[29].mxu0 }
 0x195   : > { %v1162_v27 = vadd.f32 %v1161_v26, %v1160_v25  ;;  %v1163_v28 = vpop.f32.mrb[30].mxu0 }
 0x196   : > { %v1164_v29 = vpop.f32.mrb[31].mxu0 }
 0x197   : > { %v1165_v30 = vadd.f32 %v1164_v29, %v1163_v28 }
 0x199   : > { %v579_v31 = vpack.c.bf16 %v1165_v30, %v1162_v27 }
 0x19b   : > { %1211 = vmatmul.mubr.bf16.gmra.mrb[12].mxu1 %v579_v31 }
 0x23e   : > { %v1200_v33 = vpop.f32.mrb[0].mxu1 }
 0x23f   : > { %v694_v34 = vadd.f32 %v1200_v33, %v1667_v32  ;;  %v685_v35 = vpop.f32.mrb[1].mxu1 }
 0x240   : > { %v686_v36 = vadd.f32 %v1667_v32, %v685_v35  ;;  %v1201_v37 = vpop.f32.mrb[2].mxu1 }
 0x241   : > { %v766_v38 = vmul.f32 0.01, %v694_v34  ;;  %v697_v39 = vadd.f32 %v1201_v37, %v1667_v32  ;;  %v688_v40 = vpop.f32.mrb[3].mxu1  ;;  %vm750_vm0 = vcmp.gt.f32.partialorder %v694_v34, 0.0 }
 0x242   : > { %v764_v41 = vmul.f32 0.01, %v686_v36  ;;  %v689_v42 = vadd.f32 %v1667_v32, %v688_v40  ;;  %vm748_vm1 = vcmp.gt.f32.partialorder %v686_v36, 0.0 }
 0x243   : > { %vm751_vm2 = vcmp.gt.f32.partialorder %v697_v39, 0.0  ;;  %v767_v43 = vmul.f32 0.01, %v697_v39  ;;  %v782_v45 = vsel %vm750_vm0, %v694_v34, %v766_v38 }
 0x244   : > { %vm749_vm3 = vcmp.gt.f32.partialorder %v689_v42, 0.0  ;;  %v765_v44 = vmul.f32 0.01, %v689_v42  ;;  %v780_v47 = vsel %vm748_vm1, %v686_v36, %v764_v41 }
 0x245   : > { %v783_v46 = vsel %vm751_vm2, %v697_v39, %v767_v43 }
 0x246   : > { %v1063_v48 = vpack.c.bf16 %v783_v46, %v782_v45  ;;  %v781_v49 = vsel %vm749_vm3, %v689_v42, %v765_v44 }
 0x247   : > { %v1058_v50 = vpack.c.bf16 %v781_v49, %v780_v47 }
 0x248   : > { %1095 = vst [vmem:[%s1676_s10 + $0x8] sm:$0xff] %v1063_v48  }
 0x249   : > { %1059 = vst [vmem:[%s1676_s10] sm:$0xff] %v1058_v50  }
 0x24e   : > { %v1204_v51 = vpop.f32.mrb[4].mxu1 }
 0x24f   : > { %v710_v52 = vadd.f32 %v1204_v51, %v1667_v32  ;;  %v701_v53 = vpop.f32.mrb[5].mxu1 }
 0x250   : > { %v702_v54 = vadd.f32 %v1667_v32, %v701_v53  ;;  %v1205_v55 = vpop.f32.mrb[6].mxu1 }
 0x251   : > { %v770_v56 = vmul.f32 0.01, %v710_v52  ;;  %v713_v57 = vadd.f32 %v1205_v55, %v1667_v32  ;;  %v704_v58 = vpop.f32.mrb[7].mxu1  ;;  %vm754_vm4 = vcmp.gt.f32.partialorder %v710_v52, 0.0 }
 0x252   : > { %v768_v59 = vmul.f32 0.01, %v702_v54  ;;  %v705_v60 = vadd.f32 %v1667_v32, %v704_v58  ;;  %vm752_vm5 = vcmp.gt.f32.partialorder %v702_v54, 0.0 }
 0x253   : > { %vm755_vm6 = vcmp.gt.f32.partialorder %v713_v57, 0.0  ;;  %v771_v61 = vmul.f32 0.01, %v713_v57  ;;  %v786_v63 = vsel %vm754_vm4, %v710_v52, %v770_v56 }
 0x254   : > { %vm753_vm7 = vcmp.gt.f32.partialorder %v705_v60, 0.0  ;;  %v769_v62 = vmul.f32 0.01, %v705_v60  ;;  %v784_v1 = vsel %vm752_vm5, %v702_v54, %v768_v59 }
 0x255   : > { %v787_v0 = vsel %vm755_vm6, %v713_v57, %v771_v61 }
 0x256   : > { %v1073_v2 = vpack.c.bf16 %v787_v0, %v786_v63  ;;  %v785_v3 = vsel %vm753_vm7, %v705_v60, %v769_v62 }
 0x257   : > { %v1068_v4 = vpack.c.bf16 %v785_v3, %v784_v1 }
 0x258   : > { %1097 = vst [vmem:[%s1676_s10 + $0x18] sm:$0xff] %v1073_v2  }
 0x259   : > { %1096 = vst [vmem:[%s1676_s10 + $0x10] sm:$0xff] %v1068_v4  }
 0x25e   : > { %v1208_v5 = vpop.f32.mrb[8].mxu1 }
 0x25f   : > { %v726_v6 = vadd.f32 %v1208_v5, %v1667_v32  ;;  %v717_v7 = vpop.f32.mrb[9].mxu1 }
 0x260   : > { %v718_v8 = vadd.f32 %v1667_v32, %v717_v7  ;;  %v1209_v9 = vpop.f32.mrb[10].mxu1 }
 0x261   : > { %v774_v10 = vmul.f32 0.01, %v726_v6  ;;  %v729_v11 = vadd.f32 %v1209_v9, %v1667_v32  ;;  %v720_v12 = vpop.f32.mrb[11].mxu1  ;;  %vm758_vm8 = vcmp.gt.f32.partialorder %v726_v6, 0.0 }
 0x262   : > { %v772_v13 = vmul.f32 0.01, %v718_v8  ;;  %v721_v14 = vadd.f32 %v1667_v32, %v720_v12  ;;  %vm756_vm9 = vcmp.gt.f32.partialorder %v718_v8, 0.0 }
 0x263   : > { %vm759_vm10 = vcmp.gt.f32.partialorder %v729_v11, 0.0  ;;  %v775_v15 = vmul.f32 0.01, %v729_v11  ;;  %v790_v17 = vsel %vm758_vm8, %v726_v6, %v774_v10 }
 0x264   : > { %vm757_vm11 = vcmp.gt.f32.partialorder %v721_v14, 0.0  ;;  %v773_v16 = vmul.f32 0.01, %v721_v14  ;;  %v788_v19 = vsel %vm756_vm9, %v718_v8, %v772_v13 }
 0x265   : > { %v791_v18 = vsel %vm759_vm10, %v729_v11, %v775_v15 }
 0x266   : > { %v1083_v20 = vpack.c.bf16 %v791_v18, %v790_v17  ;;  %v789_v21 = vsel %vm757_vm11, %v721_v14, %v773_v16 }
 0x267   : > { %v1078_v22 = vpack.c.bf16 %v789_v21, %v788_v19 }
 0x268   : > { %1099 = vst [vmem:[%s1676_s10 + $0x28] sm:$0xff] %v1083_v20  }
 0x269   : > { %1098 = vst [vmem:[%s1676_s10 + $0x20] sm:$0xff] %v1078_v22  }
 0x26e   : > { %v1212_v23 = vpop.f32.mrb[12].mxu1 }
 0x26f   : > { %v742_v24 = vadd.f32 %v1212_v23, %v1667_v32  ;;  %v733_v25 = vpop.f32.mrb[13].mxu1 }
 0x270   : > { %v734_v26 = vadd.f32 %v1667_v32, %v733_v25  ;;  %v1213_v27 = vpop.f32.mrb[14].mxu1 }
 0x271   : > { %v778_v28 = vmul.f32 0.01, %v742_v24  ;;  %v745_v29 = vadd.f32 %v1213_v27, %v1667_v32  ;;  %v736_v30 = vpop.f32.mrb[15].mxu1  ;;  %vm762_vm12 = vcmp.gt.f32.partialorder %v742_v24, 0.0 }
 0x272   : > { %v776_v31 = vmul.f32 0.01, %v734_v26  ;;  %v737_v33 = vadd.f32 %v1667_v32, %v736_v30  ;;  %vm760_vm13 = vcmp.gt.f32.partialorder %v734_v26, 0.0 }
 0x273   : > { %vm763_vm14 = vcmp.gt.f32.partialorder %v745_v29, 0.0  ;;  %v779_v34 = vmul.f32 0.01, %v745_v29  ;;  %v794_v36 = vsel %vm762_vm12, %v742_v24, %v778_v28 }
 0x274   : > { %vm761_vm15 = vcmp.gt.f32.partialorder %v737_v33, 0.0  ;;  %v777_v35 = vmul.f32 0.01, %v737_v33  ;;  %v792_v38 = vsel %vm760_vm13, %v734_v26, %v776_v31 }
 0x275   : > { %v795_v37 = vsel %vm763_vm14, %v745_v29, %v779_v34 }
 0x276   : > { %v1093_v39 = vpack.c.bf16 %v795_v37, %v794_v36  ;;  %v793_v40 = vsel %vm761_vm15, %v737_v33, %v777_v35 }
 0x277   : > { %v1088_v41 = vpack.c.bf16 %v793_v40, %v792_v38 }
 0x278   : > { %1101 = vst [vmem:[%s1676_s10 + $0x38] sm:$0xff] %v1093_v39  }
 0x279   : > { %1100 = vst [vmem:[%s1676_s10 + $0x30] sm:$0xff] %v1088_v41  }
 0x27a PF: > { %p15_p6 = scmp.ge.s32.totalorder %s1580_s7, 4   ;;  %s1728_s15 = smov %s1442_s16 }
 0x27b   : > { %s1729_s16 = smov %s1446_s17  ;;  %s1730_s17 = smov %s1591_s12 }
 0x27c   : > { %s1731_s18 = smov %s1580_s7  ;;  %17 = sbr.rel (!%p15_p6) target bundleno = 4 (0x4), region = 84 }
 0x283   :  { %898 = vsyncpa [#allocation3], 1 }
 0x284   :  { %900 = vsyncpa [#allocation3 + $0x1], 1 }
 0x285   :  { %901 = vsyncpa [#allocation5], 1 }

</bundles_post_ra>
